<compile_context>
chip_gen: v5e
topology: v5e:2x2
jax: 0.10.0
libtpu: 0.0.40
codegen_flags: <defaults>
</compile_context>

<pallas_src>
import jax
import jax.numpy as jnp
from jax.experimental import pallas as pl
from jax.experimental.pallas import tpu as pltpu


def _round_up(x, m):
    return ((x + m - 1) // m) * m


def _linear_kernel(x_ref, w_ref, b_ref, o_ref):
    # x_ref: (B, D_in) bf16 ; w_ref: (D_in, TN) bf16 ; b_ref: (1, TN) f32 ; o_ref: (B, TN) f32
    acc = jnp.dot(x_ref[...], w_ref[...], preferred_element_type=jnp.float32)
    o_ref[...] = (acc + b_ref[...]).astype(o_ref.dtype)


def classifier_covnext_t(x, w_t, b, *, tn=512):
    """logits = x @ w_t + b   (forward of Classifier_covnextT)

    x   : (B, 768)            float32
    w_t : (768, num_classes)  float32  (transpose of PyTorch fc.weight)
    b   : (num_classes,)      float32
    returns (B, num_classes)  float32
    """
    B, D_in = x.shape
    D_out = w_t.shape[1]

    # Lane-dense padding of the class axis; keep the step count small.
    tn = min(tn, _round_up(D_out, 128))
    d_pad = _round_up(D_out, tn)
    pad = d_pad - D_out
    n_tiles = d_pad // tn

    # bf16 inputs, f32 accumulate / bias add.
    x_bf = x.astype(jnp.bfloat16)
    w_bf = jnp.pad(w_t, ((0, 0), (0, pad))).astype(jnp.bfloat16)
    b_f32 = jnp.pad(b, (0, pad)).astype(jnp.float32).reshape(1, d_pad)

    cost = pl.CostEstimate(
        flops=2 * B * D_in * d_pad,
        transcendentals=0,
        bytes_accessed=(x_bf.size * 2 + w_bf.size * 2 + b_f32.size * 4
                        + B * d_pad * 4),
    )

    out_padded = pl.pallas_call(
        _linear_kernel,
        out_shape=jax.ShapeDtypeStruct((B, d_pad), jnp.float32),
        grid_spec=pltpu.PrefetchScalarGridSpec(
            num_scalar_prefetch=0,
            grid=(n_tiles,),
            in_specs=[
                # x stays fully resident across class tiles.
                pl.BlockSpec((B, D_in), lambda j: (0, 0)),
                # Weight / bias / output tile along the class axis -> pipelined DMA.
                pl.BlockSpec((D_in, tn), lambda j: (0, j)),
                pl.BlockSpec((1, tn), lambda j: (0, j)),
            ],
            out_specs=pl.BlockSpec((B, tn), lambda j: (0, j)),
        ),
        compiler_params=pltpu.CompilerParams(
            dimension_semantics=("parallel",),
        ),
        cost_estimate=cost,
    )(x_bf, w_bf, b_f32)

    if pad:
        out_padded = out_padded[:, :D_out]
    return out_padded


def init_params(key, in_features=768, num_classes=1000, dtype=jnp.float32):
    # Mirrors nn.Linear(768, num_classes) default init (uniform +/- 1/sqrt(fan_in)).
    kw, kb = jax.random.split(key)
    bound = 1.0 / jnp.sqrt(jnp.array(in_features, dtype))
    w = jax.random.uniform(kw, (num_classes, in_features), dtype, -bound, bound)
    b = jax.random.uniform(kb, (num_classes,), dtype, -bound, bound)
    return w, b


if __name__ == "__main__":
    key = jax.random.PRNGKey(0)
    k_x, k_p = jax.random.split(key)

    B = 8
    IN_FEATURES = 768
    NUM_CLASSES = 1000

    x = jax.random.normal(k_x, (B, IN_FEATURES), jnp.float32)
    w, b = init_params(k_p, IN_FEATURES, NUM_CLASSES)
    w_t = w.T  # (768, num_classes)

    logits = classifier_covnext_t(x, w_t, b)
    jax.block_until_ready(logits)

    # Sanity check against plain JAX f32 reference (bf16 inputs -> loose tol).
    ref = x @ w_t + b
    assert logits.shape == (B, NUM_CLASSES)
    max_err = jnp.max(jnp.abs(logits - ref))
    assert max_err < 5e-2, f"max abs error {max_err}"

    print("KERNEL_OK")
</pallas_src>

<mosaic_0001>
module attributes {stable_mosaic.version = 11 : i64} {
  func.func @_linear_kernel(%arg0: i32, %arg1: memref<8x768xbf16, #tpu.memory_space<vmem>>, %arg2: memref<768x512xbf16, #tpu.memory_space<vmem>>, %arg3: memref<1x512xf32, #tpu.memory_space<vmem>>, %arg4: memref<8x512xf32, #tpu.memory_space<vmem>>) attributes {dimension_semantics = [#tpu.dimension_semantics<parallel>], iteration_bounds = array<i64: 2>, scalar_prefetch = 0 : i64, scratch_operands = 0 : i64, tpu.core_type = #tpu.core_type<tc>, window_params = [{pipeline_mode = #tpu.pipeline_mode<synchronous>, transform_indices = @transform_0, window_bounds = array<i64: 8, 768>}, {transform_indices = @transform_1, window_bounds = array<i64: 768, 512>}, {transform_indices = @transform_2, window_bounds = array<i64: 1, 512>}, {transform_indices = @transform_3, window_bounds = array<i64: 8, 512>}]} {
    %c0 = arith.constant 0 : index
    %c0_0 = arith.constant 0 : index
    %0 = vector.load %arg1[%c0, %c0_0] : memref<8x768xbf16, #tpu.memory_space<vmem>>, vector<8x768xbf16>
    %c0_1 = arith.constant 0 : index
    %c0_2 = arith.constant 0 : index
    %1 = vector.load %arg2[%c0_1, %c0_2] : memref<768x512xbf16, #tpu.memory_space<vmem>>, vector<768x512xbf16>
    %cst = arith.constant dense<0.000000e+00> : vector<8x512xf32>
    %2 = tpu.matmul %0, %1, %cst {dimension_numbers = #tpu.dot_dimension_numbers<[1], [0], [0], [1], [0, 0, 1, 1], [], []>} : vector<8x768xbf16>, vector<768x512xbf16>, vector<8x512xf32> -> vector<8x512xf32>
    %c0_3 = arith.constant 0 : index
    %c0_4 = arith.constant 0 : index
    %3 = vector.load %arg3[%c0_3, %c0_4] : memref<1x512xf32, #tpu.memory_space<vmem>>, vector<1x512xf32>
    %4 = vector.broadcast %3 : vector<1x512xf32> to vector<8x512xf32>
    %5 = arith.addf %2, %4 : vector<8x512xf32>
    %c0_5 = arith.constant 0 : index
    %c0_6 = arith.constant 0 : index
    %6 = vector.load %arg4[%c0_5, %c0_6] : memref<8x512xf32, #tpu.memory_space<vmem>>, vector<8x512xf32>
    tpu.vector_store %arg4[%c0_5, %c0_6], %5 {strides = array<i32>} : memref<8x512xf32, #tpu.memory_space<vmem>>, vector<8x512xf32>,
    return
  }
  func.func @transform_0(%arg0: i32) -> (i32, i32) {
    %c0_i32 = arith.constant 0 : i32
    %c0_i32_0 = arith.constant 0 : i32
    %c0_i32_1 = arith.constant 0 : i32
    return %c0_i32, %c0_i32_0 : i32, i32
  }
  func.func @transform_1(%arg0: i32) -> (i32, i32) {
    %c0_i32 = arith.constant 0 : i32
    %c0_i32_0 = arith.constant 0 : i32
    return %c0_i32, %arg0 : i32, i32
  }
  func.func @transform_2(%arg0: i32) -> (i32, i32) {
    %c0_i32 = arith.constant 0 : i32
    %c0_i32_0 = arith.constant 0 : i32
    return %c0_i32, %arg0 : i32, i32
  }
  func.func @transform_3(%arg0: i32) -> (i32, i32) {
    %c0_i32 = arith.constant 0 : i32
    %c0_i32_0 = arith.constant 0 : i32
    return %c0_i32, %arg0 : i32, i32
  }
}

</mosaic_0001>

<bundles_post_ra>
// kernel: tpu_custom_call.1
= control target key start
LH: loop header
LB: loop body
LE: loop exit
PB: predicated region body
PF: predicated region fallthrough
CT: control target
= control target key end

     0   :  { %s3706_s0 = inlined_call_operand.hbm [shape: bf16[8,768], index: 0, kind: input, shape index: {}]   ;;  %s3707_s1 = inlined_call_operand.hbm [shape: bf16[768,1024], index: 1, kind: input, shape index: {}]   ;;  %s3708_s2 = inlined_call_operand.hbm [shape: f32[1,1024], index: 2, kind: input, shape index: {}]   ;;  %s3709_s3 = inlined_call_operand.hbm [shape: f32[8,1024], index: 3, kind: output, shape index: {}]  }
   0x1   :  { %3710 = sst [smem:[#allocation12_spill]] %s3706_s0 }
   0x2   :  { %8 = vsyncpa [#allocation3], 0 }
   0x3   :  { %9 = vsyncpa [#allocation6], 0 }
   0x4   :  { %11 = vsyncpa [#allocation6 + $0x1], 0 }
   0x5   :  { %12 = vsyncpa [#allocation4], 0 }
   0x6   :  { %14 = vsyncpa [#allocation4 + $0x1], 0  ;;  %s3098_s12 = smov 0   ;;  %s3100_s13 = smov 0  }
   0x7   :  { %s3102_s14 = smov 0   ;;  %s3104_s15 = smov 0  }
   0x8 LB: > { %s3119_s16 = sadd.s32 1, %s3072_s15   ;;  %s48_s17 = sadd.s32 1, %s3068_s14  ;;  %s3072_s15 = sphi %s3104_s15, %s3721_s15   ;;  %s3068_s14 = sphi %s3102_s14, %s3720_s14   ;;  %s3064_s13 = sphi %s3100_s13, %s3719_s13   ;;  %s3060_s12 = sphi %s3098_s12, %s3718_s12  }
   0x9   : > { %s45_s18 = ssub.s32 %s3072_s15, %s3119_s16  ;;  %p55_p0 = scmp.ne.s32.totalorder %s3068_s14, %s3064_s13 }
   0xa   : > { %p46_p1 = scmp.eq.s32.totalorder %s45_s18, 0  ;;  %p56_p2 = scmp.eq.s32.totalorder %s3072_s15, 0 }
   0xb   : > { %p2873_p4 = scmp.lt.s32.totalorder %s3072_s15, 2  ;;  %s149_s20 = sand.u32 1, %s3072_s15  }
   0xc   : > { %s3130_s19 = scalar_select %p46_p1, %s3068_s14, %s48_s17  }
   0xd   : > { %p57_p5 = por %p56_p2, %p55_p0  ;;  %s151_s21 = sand.u32 1, %s3068_s14  }
   0xe   : > { %s2845_s22 = smul.u32 1536, %s151_s21  ;;  %s2651_s23 = sshll.u32 %s3072_s15, 4 }
   0xf   : > { %s158_s26 = scalar_lea.hbm %s3707_s1, %s2651_s23  ;;  %p3143_p6 = pnand %p2873_p4, %p57_p5 }
  0x10   : > { %s159_s28 = sshll.u32 %s158_s26, 4  ;;  %s153_s29 = scalar_lea.vmem [#allocation5], %s2845_s22  ;;  %s160_s28 = int_to_ptr.hbm [resolvable:$true] %s159_s28 }
  0x11   : > { %s161_s30 = sshll.u32 %s153_s29, 4  ;;  %s3147_s4 = scalar_lea.sflag [#allocation6], %s149_s20  ;;  %s162_s30 = int_to_ptr.vmem [resolvable:$true] %s161_s30 }
  0x12   : > { %s2912_s5 = sshra.s32 %s160_s28, 4  ;;  %p2916_p8 = pneg %p3143_p6  ;;  %s2913_s5 = int_to_ptr.hbm [resolvable:$true] %s2912_s5 }
  0x13   : > { %s2914_s6 = scalar_lea.hbm %s2913_s5, 1536  ;;  %s2919_s9 = scalar_lea.hbm %s3707_s1, 3072 }
  0x14   : > { %p2915_p7 = scmp.ne.s32.totalorder %s2913_s5, %s2914_s6  ;;  %p2920_p11 = scmp.lt.s32.totalorder %s2913_s5, %s3707_s1 }
  0x15   : > { %p2921_p12 = scmp.lt.s32.totalorder %s2919_s9, %s2914_s6 }
  0x16   : > { %p2917_p9 = pnand %p2916_p8, %p2915_p7 }
  0x17   : > { %p2922_p13 = por %p2921_p12, %p2920_p11 }
  0x18   : > { %p2918_p10 = pneg %p2917_p9 }
  0x1a   : > { %p2923_p1 = pnand %p2922_p13, %p2918_p10 }
  0x1c   : > { %2926 = shalt.err (!%p2923_p1)
}
  0x1d   : > { %s3074_s17 = smov 512   ;;  %s3075_s18 = smov 256  }
  0x1e   : > { %s3076_s20 = smov 16   ;;  %s3164_s22 = sadd.s32 4294967295, %s3072_s15  }
  0x1f   : > { %2864 = dma.hbm_to_vmem [thread:$0]  (!%p3143_p6), %s160_s28, 24576, %s162_s30, %s3147_s4, %s3074_s17, %s3075_s18, %s3076_s20  }
  0x20   : > { %s1866_s23 = sadd.s32 4294967294, %s3072_s15   ;;  %p61_p2 = scmp.ne.s32.totalorder %s3064_s13, %s3060_s12 }
  0x21   : > { %p62_p4 = scmp.eq.s32.totalorder %s3164_s22, 0  ;;  %p111_p5 = scmp.eq.s32.totalorder %s3164_s22, 1 }
  0x22   : > { %p117_p7 = scmp.eq.s32.totalorder %s1866_s23, 1  ;;  %p1867_p9 = scmp.ge.s32.totalorder %s3072_s15, 1 }
  0x23   : > { %p3174_p10 = por %p62_p4, %p61_p2  ;;  %p3181_p11 = por %p111_p5, %p55_p0 }
  0x24   : > { %p3185_p12 = por %p117_p7, %p61_p2  ;;  %p124_p13 = scmp.lt.s32.totalorder %s3072_s15, 3 }
  0x25   : > { %s3715_s0 = sld [smem:[#allocation12_spill]]  ;;  %s1872_s6 = sshll.u32 %s151_s21, 2 }
  0x26   : > { %p3193_p1 = pnand %p1867_p9, %p124_p13  ;;  %s3077_s7 = smov [#allocation2]  }
  0x27   : > { %s138_s8 = sshll.u32 %s3077_s7, 4  ;;  %s1873_s9 = sshll.u32 %s3072_s15, 2  ;;  %s139_s8 = int_to_ptr.vmem [resolvable:$true] %s138_s8 }
  0x28   : > { %p2857_p0 = pneg %p3193_p1  ;;  %s179_s17 = scalar_lea.hbm %s3708_s2, %s1873_s9 }
  0x29   : > { %s175_s18 = scalar_lea.vmem [#allocation7], %s1872_s6  ;;  %s181_s23 = sshll.u32 %s179_s17, 4  ;;  %s182_s23 = int_to_ptr.hbm [resolvable:$true] %s181_s23 }
  0x2a   : > { %p2858_p2 = pnand %p2857_p0, %p62_p4  ;;  %s183_s20 = sshll.u32 %s175_s18, 4  ;;  %s184_s20 = int_to_ptr.vmem [resolvable:$true] %s183_s20 }
  0x2b   : > { %s136_s30 = sshll.u32 %s3715_s0, 4  ;;  %s2972_s21 = sshra.s32 %s182_s23, 4  ;;  %s137_s30 = int_to_ptr.hbm [resolvable:$true] %s136_s30  ;;  %s2973_s21 = int_to_ptr.hbm [resolvable:$true] %s2972_s21 }
  0x2c   : > { %2860 = dma.hbm_to_vmem [thread:$0]  (!%p2858_p2), %s137_s30, 384, %s139_s8, [#allocation3]  }
  0x2d   : > { %s2974_s28 = scalar_lea.hbm %s2973_s21, 4  ;;  %s2979_s0 = scalar_lea.hbm %s3708_s2, 8 }
  0x2e   : > { %p2975_p5 = scmp.ne.s32.totalorder %s2973_s21, %s2974_s28  ;;  %p2980_p13 = scmp.lt.s32.totalorder %s2973_s21, %s3708_s2 }
  0x2f   : > { %p2981_p0 = scmp.lt.s32.totalorder %s2979_s0, %s2974_s28 }
  0x30   : > { %p2977_p7 = pnand %p2975_p5, %p2916_p8 }
  0x31   : > { %p2982_p2 = por %p2981_p0, %p2980_p13 }
  0x32   : > { %p2978_p9 = pneg %p2977_p7 }
  0x34   : > { %p2983_p3 = pnand %p2982_p2, %p2978_p9 }
  0x36   : > { %2986 = shalt.err (!%p2983_p3)
}
  0x37   : > { %2867 = dma.hbm_to_vmem [thread:$0]  (!%p3143_p6), %s182_s23, 64, %s184_s20, %s3147_s4  }
  0x38   : > { %192 = sbr.rel (%p3193_p1) target bundleno = 404 (0x194), region = 32 }
  0x3d   : > { %3047 = dma.done.wait (%p62_p4), [#allocation3], 384  }
  0x3e   : > { %3049 = vsyncadd (%p62_p4), [#allocation3], 4294966912  ;;  %s199_s0 = sand.u32 1, %s3164_s22   ;;  %s3227_s30 = sand.u32 1, %s3064_s13  }
  0x3f   : > { %s2846_s6 = smul.u32 1536, %s3227_s30  ;;  %s200_s27 = scalar_lea.sflag [#allocation6], %s199_s0 }
  0x41   : > { %s3230_s8 = scalar_lea.vmem [#allocation5], %s2846_s6 }
  0x42   : > { %3051 = dma.done.wait (%p3174_p10), %s200_s27, 24640  }
  0x43   : > { %3053 = vsyncadd (%p3174_p10), %s200_s27, 4294942656  ;;  %v1992_v0 = vld [vmem:[%s3230_s8 + $0xe0] sm:$0xf]  ;;  %v2682_v1 = vld [vmem:[%s3230_s8 + $0xec] sm:$0xf0]  ;;  %s1876_s4 = sshll.u32 %s3227_s30, 2 }
  0x44   : > { %v2120_v2 = vld [vmem:[%s3230_s8 + $0x1e0] sm:$0xf]  ;;  %v1993_v3 = vor.u32 %v2682_v1, %v1992_v0  ;;  %v2714_v4 = vld [vmem:[%s3230_s8 + $0x1ec] sm:$0xf0]  ;;  %s213_s24 = scalar_lea.vmem [#allocation7], %s1876_s4  ;;  %s1877_s5 = sshll.u32 %s3227_s30, 5 }
  0x45   : > { %v2248_v5 = vld [vmem:[%s3230_s8 + $0x2e0] sm:$0xf]  ;;  %v2746_v6 = vld [vmem:[%s3230_s8 + $0x2ec] sm:$0xf0]  ;;  %v2121_v7 = vor.u32 %v2714_v4, %v2120_v2  ;;  %s3663_s11 = scalar_lea.vmem [#allocation8], %s1877_s5  ;;  %s2844_s17 = sshll.u32 %s3164_s22, 5 }
  0x46   : > { %v2249_v8 = vor.u32 %v2746_v6, %v2248_v5  ;;  %v2376_v9 = vld [vmem:[%s3230_s8 + $0x3e0] sm:$0xf]  ;;  %v2778_v10 = vld [vmem:[%s3230_s8 + $0x3ec] sm:$0xf0]  ;;  %1431 = vmatpush.bf16.msra.mxu0 %v1993_v3  ;;  %s1759_s23 = scalar_lea.hbm %s3709_s3, %s2844_s17  ;;  %s1761_s21 = sshll.u32 %s3663_s11, 4  ;;  %s1762_s21 = int_to_ptr.vmem [resolvable:$true] %s1761_s21 }
  0x47   : > { %v1976_v11 = vld [vmem:[%s3230_s8 + $0xc0] sm:$0xf]  ;;  %v2377_v12 = vor.u32 %v2778_v10, %v2376_v9  ;;  %v2678_v13 = vld [vmem:[%s3230_s8 + $0xcc] sm:$0xf0]  ;;  %1444 = vmatpush.bf16.msra.mxu1 %v2121_v7  ;;  %s1763_s28 = sshll.u32 %s1759_s23, 4  ;;  %s1748_s29 = scalar_lea.sflag [#allocation4], %s3227_s30  ;;  %s1764_s28 = int_to_ptr.hbm [resolvable:$true] %s1763_s28 }
  0x48   : > { %v2104_v14 = vld [vmem:[%s3230_s8 + $0x1c0] sm:$0xf]  ;;  %v2710_v15 = vld [vmem:[%s3230_s8 + $0x1cc] sm:$0xf0]  ;;  %1457 = vmatpush.bf16.msra.mxu2 %v2249_v8  ;;  %v1977_v16 = vor.u32 %v2678_v13, %v1976_v11  ;;  %s3016_s22 = sshra.s32 %s1764_s28, 4  ;;  %s3022_s0 = scalar_lea.hbm %s3709_s3, 64  ;;  %s3017_s22 = int_to_ptr.hbm [resolvable:$true] %s3016_s22 }
  0x49   : > { %v2105_v17 = vor.u32 %v2710_v15, %v2104_v14  ;;  %v2232_v18 = vld [vmem:[%s3230_s8 + $0x2c0] sm:$0xf]  ;;  %v2742_v19 = vld [vmem:[%s3230_s8 + $0x2cc] sm:$0xf0]  ;;  %1470 = vmatpush.bf16.msra.mxu3 %v2377_v12  ;;  %s3018_s7 = scalar_lea.hbm %s3017_s22, 32  ;;  %p3023_p4 = scmp.lt.s32.totalorder %s3017_s22, %s3709_s3 }
  0x4a   : > { %v2360_v20 = vld [vmem:[%s3230_s8 + $0x3c0] sm:$0xf]  ;;  %v2233_v21 = vor.u32 %v2742_v19, %v2232_v18  ;;  %v2774_v22 = vld [vmem:[%s3230_s8 + $0x3cc] sm:$0xf0]  ;;  %1432 = vmatpush.bf16.msra.mxu0 %v1977_v16  ;;  %p3019_p3 = scmp.ne.s32.totalorder %s3017_s22, %s3018_s7  ;;  %p3024_p10 = scmp.lt.s32.totalorder %s3022_s0, %s3018_s7 }
  0x4b   : > { %v1960_v23 = vld [vmem:[%s3230_s8 + $0xa0] sm:$0xf]  ;;  %v2674_v24 = vld [vmem:[%s3230_s8 + $0xac] sm:$0xf0]  ;;  %v2361_v25 = vor.u32 %v2774_v22, %v2360_v20  ;;  %1445 = vmatpush.bf16.msra.mxu1 %v2105_v17 }
  0x4c   : > { %v2088_v26 = vld [vmem:[%s3230_s8 + $0x1a0] sm:$0xf]  ;;  %v2706_v27 = vld [vmem:[%s3230_s8 + $0x1ac] sm:$0xf0]  ;;  %v1961_v29 = vor.u32 %v2674_v24, %v1960_v23  ;;  %1458 = vmatpush.bf16.msra.mxu2 %v2233_v21  ;;  %p3020_p6 = pnand %p3019_p3, %p3181_p11  ;;  %p3025_p1 = por %p3024_p10, %p3023_p4 }
  0x4d   : > { %v2216_v28 = vld [vmem:[%s3230_s8 + $0x2a0] sm:$0xf]  ;;  %v2738_v30 = vld [vmem:[%s3230_s8 + $0x2ac] sm:$0xf0]  ;;  %v2089_v33 = vor.u32 %v2706_v27, %v2088_v26  ;;  %1471 = vmatpush.bf16.msra.mxu3 %v2361_v25 }
  0x4e   : > { %v2344_v31 = vld [vmem:[%s3230_s8 + $0x3a0] sm:$0xf]  ;;  %v2770_v32 = vld [vmem:[%s3230_s8 + $0x3ac] sm:$0xf0]  ;;  %v2217_v34 = vor.u32 %v2738_v30, %v2216_v28  ;;  %1433 = vmatpush.bf16.msra.mxu0 %v1961_v29  ;;  %p3021_p8 = pneg %p3020_p6 }
  0x4f   : > { %v1944_v35 = vld [vmem:[%s3230_s8 + $0x80] sm:$0xf]  ;;  %v2670_v36 = vld [vmem:[%s3230_s8 + $0x8c] sm:$0xf0]  ;;  %v2345_v38 = vor.u32 %v2770_v32, %v2344_v31  ;;  %1446 = vmatpush.bf16.msra.mxu1 %v2089_v33  ;;  %v2680_v33 = vld [vmem:[%s3230_s8 + $0xe4] sm:$0xf] }
  0x50   : > { %v2072_v37 = vld [vmem:[%s3230_s8 + $0x180] sm:$0xf]  ;;  %v2702_v39 = vld [vmem:[%s3230_s8 + $0x18c] sm:$0xf0]  ;;  %v1945_v44 = vor.u32 %v2670_v36, %v1944_v35  ;;  %1459 = vmatpush.bf16.msra.mxu2 %v2217_v34  ;;  %v1994_v34 = vld [vmem:[%s3230_s8 + $0xf0] sm:$0xf0]  ;;  %p3026_p5 = pnand %p3025_p1, %p3021_p8 }
  0x51   : > { %v2200_v40 = vld [vmem:[%s3230_s8 + $0x280] sm:$0xf]  ;;  %v2734_v41 = vld [vmem:[%s3230_s8 + $0x28c] sm:$0xf0]  ;;  %v2073_v45 = vor.u32 %v2702_v39, %v2072_v37  ;;  %1472 = vmatpush.bf16.msra.mxu3 %v2345_v38  ;;  %v2712_v37 = vld [vmem:[%s3230_s8 + $0x1e4] sm:$0xf] }
  0x52   : > { %v2328_v42 = vld [vmem:[%s3230_s8 + $0x380] sm:$0xf]  ;;  %v2766_v43 = vld [vmem:[%s3230_s8 + $0x38c] sm:$0xf0]  ;;  %v2201_v46 = vor.u32 %v2734_v41, %v2200_v40  ;;  %1434 = vmatpush.bf16.msra.mxu0 %v1945_v44  ;;  %v2122_v38 = vld [vmem:[%s3230_s8 + $0x1f0] sm:$0xf0] }
  0x53   : > { %v1928_v47 = vld [vmem:[%s3230_s8 + $0x60] sm:$0xf]  ;;  %v2666_v48 = vld [vmem:[%s3230_s8 + $0x6c] sm:$0xf0]  ;;  %v2329_v50 = vor.u32 %v2766_v43, %v2328_v42  ;;  %1447 = vmatpush.bf16.msra.mxu1 %v2073_v45  ;;  %v1997_v42 = vor.u32 %v2680_v33, %v1994_v34  ;;  %v2058_v33 = vld [vmem:[%s3230_s8 + $0x170] sm:$0xf0] }
  0x54   : > { %v2056_v49 = vld [vmem:[%s3230_s8 + $0x160] sm:$0xf]  ;;  %v2698_v51 = vld [vmem:[%s3230_s8 + $0x16c] sm:$0xf0]  ;;  %v1929_v56 = vor.u32 %v2666_v48, %v1928_v47  ;;  %1460 = vmatpush.bf16.msra.mxu2 %v2201_v46  ;;  %v2125_v46 = vor.u32 %v2712_v37, %v2122_v38  ;;  %v2676_v48 = vld [vmem:[%s3230_s8 + $0xc4] sm:$0xf] }
  0x55   : > { %v2184_v52 = vld [vmem:[%s3230_s8 + $0x260] sm:$0xf]  ;;  %v2730_v53 = vld [vmem:[%s3230_s8 + $0x26c] sm:$0xf0]  ;;  %v2057_v57 = vor.u32 %v2698_v51, %v2056_v49  ;;  %1473 = vmatpush.bf16.msra.mxu3 %v2329_v50  ;;  %v1978_v49 = vld [vmem:[%s3230_s8 + $0xd0] sm:$0xf0] }
  0x56   : > { %v2312_v54 = vld [vmem:[%s3230_s8 + $0x360] sm:$0xf]  ;;  %v2762_v55 = vld [vmem:[%s3230_s8 + $0x36c] sm:$0xf0]  ;;  %v2185_v58 = vor.u32 %v2730_v53, %v2184_v52  ;;  %1435 = vmatpush.bf16.msra.mxu0 %v1929_v56  ;;  %v2708_v50 = vld [vmem:[%s3230_s8 + $0x1c4] sm:$0xf] }
  0x57   : > { %v1912_v59 = vld [vmem:[%s3230_s8 + $0x40] sm:$0xf]  ;;  %v2662_v60 = vld [vmem:[%s3230_s8 + $0x4c] sm:$0xf0]  ;;  %v2313_v62 = vor.u32 %v2762_v55, %v2312_v54  ;;  %1448 = vmatpush.bf16.msra.mxu1 %v2057_v57  ;;  %v2106_v51 = vld [vmem:[%s3230_s8 + $0x1d0] sm:$0xf0]  ;;  %v1981_v55 = vor.u32 %v2676_v48, %v1978_v49 }
  0x58   : > { %v2040_v61 = vld [vmem:[%s3230_s8 + $0x140] sm:$0xf]  ;;  %v2694_v63 = vld [vmem:[%s3230_s8 + $0x14c] sm:$0xf0]  ;;  %v1913_v4 = vor.u32 %v2662_v60, %v1912_v59  ;;  %1461 = vmatpush.bf16.msra.mxu2 %v2185_v58  ;;  %v2109_v59 = vor.u32 %v2708_v50, %v2106_v51  ;;  %v2672_v60 = vld [vmem:[%s3230_s8 + $0xa4] sm:$0xf] }
  0x59   : > { %v2168_v0 = vld [vmem:[%s3230_s8 + $0x240] sm:$0xf]  ;;  %v2726_v1 = vld [vmem:[%s3230_s8 + $0x24c] sm:$0xf0]  ;;  %v2041_v5 = vor.u32 %v2694_v63, %v2040_v61  ;;  %1474 = vmatpush.bf16.msra.mxu3 %v2313_v62  ;;  %v1962_v61 = vld [vmem:[%s3230_s8 + $0xb0] sm:$0xf0] }
  0x5a   : > { %v2296_v2 = vld [vmem:[%s3230_s8 + $0x340] sm:$0xf]  ;;  %v2758_v3 = vld [vmem:[%s3230_s8 + $0x34c] sm:$0xf0]  ;;  %v2169_v6 = vor.u32 %v2726_v1, %v2168_v0  ;;  %1436 = vmatpush.bf16.msra.mxu0 %v1913_v4  ;;  %v2704_v62 = vld [vmem:[%s3230_s8 + $0x1a4] sm:$0xf]  ;;  %v1965_v4 = vor.u32 %v2672_v60, %v1962_v61 }
  0x5b   : > { %v1896_v7 = vld [vmem:[%s3230_s8 + $0x20] sm:$0xf]  ;;  %v2658_v8 = vld [vmem:[%s3230_s8 + $0x2c] sm:$0xf0]  ;;  %v2297_v10 = vor.u32 %v2758_v3, %v2296_v2  ;;  %1449 = vmatpush.bf16.msra.mxu1 %v2041_v5  ;;  %v2090_v63 = vld [vmem:[%s3230_s8 + $0x1b0] sm:$0xf0] }
  0x5c   : > { %v2024_v9 = vld [vmem:[%s3230_s8 + $0x120] sm:$0xf]  ;;  %v2690_v11 = vld [vmem:[%s3230_s8 + $0x12c] sm:$0xf0]  ;;  %v1897_v16 = vor.u32 %v2658_v8, %v1896_v7  ;;  %1462 = vmatpush.bf16.msra.mxu2 %v2169_v6  ;;  %v245_v2 = vld [vmem:[#allocation2] sm:$0xff] }
  0x5d   : > { %v2152_v12 = vld [vmem:[%s3230_s8 + $0x220] sm:$0xf]  ;;  %v2722_v13 = vld [vmem:[%s3230_s8 + $0x22c] sm:$0xf0]  ;;  %v2025_v19 = vor.u32 %v2690_v11, %v2024_v9  ;;  %1475 = vmatpush.bf16.msra.mxu3 %v2297_v10  ;;  %v453_v8 = vunpack.c.l.b16 %v245_v2  ;;  %v2093_v11 = vor.u32 %v2704_v62, %v2090_v63 }
  0x5e   : > { %v2280_v14 = vld [vmem:[%s3230_s8 + $0x320] sm:$0xf]  ;;  %v2754_v15 = vld [vmem:[%s3230_s8 + $0x32c] sm:$0xf0]  ;;  %v2153_v20 = vor.u32 %v2722_v13, %v2152_v12  ;;  %1437 = vmatpush.bf16.msra.mxu0 %v1897_v16  ;;  %v2668_v13 = vld [vmem:[%s3230_s8 + $0x84] sm:$0xf] }
  0x5f   : > { %v1880_v17 = vld [vmem:[%s3230_s8] sm:$0xf]  ;;  %v2654_v18 = vld [vmem:[%s3230_s8 + $0xc] sm:$0xf0]  ;;  %v2281_v24 = vor.u32 %v2754_v15, %v2280_v14  ;;  %1450 = vmatpush.bf16.msra.mxu1 %v2025_v19  ;;  %v1946_v14 = vld [vmem:[%s3230_s8 + $0x90] sm:$0xf0]  ;;  %v454_v15 = vunpack.c.h.b16 %v245_v2 }
  0x60   : > { %v2008_v21 = vld [vmem:[%s3230_s8 + $0x100] sm:$0xf]  ;;  %v2686_v22 = vld [vmem:[%s3230_s8 + $0x10c] sm:$0xf0]  ;;  %v1881_v31 = vor.u32 %v2654_v18, %v1880_v17  ;;  %1463 = vmatpush.bf16.msra.mxu2 %v2153_v20  ;;  %v2700_v16 = vld [vmem:[%s3230_s8 + $0x184] sm:$0xf]  ;;  %v3332_v18 = vpack.c.b16 %v453_v8, %v453_v8 }
  0x61   : > { %v2136_v23 = vld [vmem:[%s3230_s8 + $0x200] sm:$0xf]  ;;  %v2718_v25 = vld [vmem:[%s3230_s8 + $0x20c] sm:$0xf0]  ;;  %v2009_v35 = vor.u32 %v2686_v22, %v2008_v21  ;;  %1476 = vmatpush.bf16.msra.mxu3 %v2281_v24  ;;  %v2074_v17 = vld [vmem:[%s3230_s8 + $0x190] sm:$0xf0]  ;;  %v3338_v22 = vpack.c.b16 %v454_v15, %v454_v15  ;;  %v1949_v24 = vor.u32 %v2668_v13, %v1946_v14 }
  0x62   : > { %v2264_v26 = vld [vmem:[%s3230_s8 + $0x300] sm:$0xf]  ;;  %v2750_v27 = vld [vmem:[%s3230_s8 + $0x30c] sm:$0xf0]  ;;  %v2137_v36 = vor.u32 %v2718_v25, %v2136_v23  ;;  %1438 = vmatpush.bf16.msra.mxu0 %v1881_v31  ;;  %v1930_v31 = vld [vmem:[%s3230_s8 + $0x70] sm:$0xf0] }
  0x63   : > { %v2504_v28 = vld [vmem:[%s3230_s8 + $0x4e0] sm:$0xf]  ;;  %v2810_v29 = vld [vmem:[%s3230_s8 + $0x4ec] sm:$0xf0]  ;;  %v2265_v39 = vor.u32 %v2750_v27, %v2264_v26  ;;  %1451 = vmatpush.bf16.msra.mxu1 %v2009_v35  ;;  %v247_v2 = vld [vmem:[#allocation2 + $0x10] sm:$0xff] }
  0x64   : > { %v2632_v30 = vld [vmem:[%s3230_s8 + $0x5e0] sm:$0xf]  ;;  %v2842_v32 = vld [vmem:[%s3230_s8 + $0x5ec] sm:$0xf0]  ;;  %v2505_v40 = vor.u32 %v2810_v29, %v2504_v28  ;;  %1464 = vmatpush.bf16.msra.mxu2 %v2137_v36  ;;  %v2077_v28 = vor.u32 %v2700_v16, %v2074_v17  ;;  %v2250_v8 = vld [vmem:[%s3230_s8 + $0x2f0] sm:$0xf0]  ;;  %v457_v14 = vunpack.c.l.b16 %v247_v2 }
  0x65   : > { %v2633_v41 = vor.u32 %v2842_v32, %v2632_v30  ;;  %v2488_v43 = vld [vmem:[%s3230_s8 + $0x4c0] sm:$0xf]  ;;  %v2806_v44 = vld [vmem:[%s3230_s8 + $0x4cc] sm:$0xf0]  ;;  %1477 = vmatpush.bf16.msra.mxu3 %v2265_v39  ;;  %v2664_v30 = vld [vmem:[%s3230_s8 + $0x64] sm:$0xf]  ;;  %1439 = vmatmul.bf16.vlgmr.msra.gmra.mxu0 %v3332_v18 }
  0x66   : > { %v2616_v45 = vld [vmem:[%s3230_s8 + $0x5c0] sm:$0xf]  ;;  %v2838_v47 = vld [vmem:[%s3230_s8 + $0x5cc] sm:$0xf0]  ;;  %1483 = vmatpush.bf16.msrb.mxu0 %v2505_v40  ;;  %v2489_v52 = vor.u32 %v2806_v44, %v2488_v43  ;;  %v2696_v32 = vld [vmem:[%s3230_s8 + $0x164] sm:$0xf]  ;;  %1452 = vmatmul.bf16.vlgmr.msra.gmra.mxu1 %v3338_v22  ;;  %v1933_v36 = vor.u32 %v2664_v30, %v1930_v31 }
  0x67   : > { %v2472_v53 = vld [vmem:[%s3230_s8 + $0x4a0] sm:$0xf]  ;;  %1496 = vmatpush.bf16.msrb.mxu1 %v2633_v41  ;;  %v2617_v54 = vor.u32 %v2838_v47, %v2616_v45  ;;  %v2802_v56 = vld [vmem:[%s3230_s8 + $0x4ac] sm:$0xf0]  ;;  %v2061_v40 = vor.u32 %v2696_v32, %v2058_v33  ;;  %v1914_v43 = vld [vmem:[%s3230_s8 + $0x50] sm:$0xf0] }
  0x68   : > { %1509 = vmatpush.bf16.msrb.mxu2 %v1997_v42  ;;  %v2600_v57 = vld [vmem:[%s3230_s8 + $0x5a0] sm:$0xf]  ;;  %v2834_v58 = vld [vmem:[%s3230_s8 + $0x5ac] sm:$0xf0]  ;;  %v2473_v0 = vor.u32 %v2802_v56, %v2472_v53  ;;  %v2660_v42 = vld [vmem:[%s3230_s8 + $0x44] sm:$0xf] }
  0x69   : > { %1522 = vmatpush.bf16.msrb.mxu3 %v2125_v46  ;;  %v2601_v1 = vor.u32 %v2834_v58, %v2600_v57  ;;  %v246_v3 = vld [vmem:[#allocation2 + $0x8] sm:$0xff]  ;;  %v2456_v5 = vld [vmem:[%s3230_s8 + $0x480] sm:$0xf]  ;;  %v2692_v44 = vld [vmem:[%s3230_s8 + $0x144] sm:$0xf]  ;;  %v1917_v48 = vor.u32 %v2660_v42, %v1914_v43 }
  0x6a   : > { %1484 = vmatpush.bf16.msrb.mxu0 %v2489_v52  ;;  %v2798_v6 = vld [vmem:[%s3230_s8 + $0x48c] sm:$0xf0]  ;;  %v2584_v7 = vld [vmem:[%s3230_s8 + $0x580] sm:$0xf]  ;;  %v455_v9 = vunpack.c.l.b16 %v246_v3  ;;  %v456_v10 = vunpack.c.h.b16 %v246_v3  ;;  %v2042_v45 = vld [vmem:[%s3230_s8 + $0x150] sm:$0xf0] }
  0x6b   : > { %1497 = vmatpush.bf16.msrb.mxu1 %v2617_v54  ;;  %v2830_v12 = vld [vmem:[%s3230_s8 + $0x58c] sm:$0xf0]  ;;  %v2457_v21 = vor.u32 %v2798_v6, %v2456_v5  ;;  %v2440_v25 = vld [vmem:[%s3230_s8 + $0x460] sm:$0xf]  ;;  %v2045_v52 = vor.u32 %v2692_v44, %v2042_v45  ;;  %v2656_v54 = vld [vmem:[%s3230_s8 + $0x24] sm:$0xf] }
  0x6c   : > { %1510 = vmatpush.bf16.msrb.mxu2 %v1981_v55  ;;  %v3334_v19 = vpack.c.b16 %v455_v9, %v455_v9  ;;  %v3336_v20 = vpack.c.b16 %v456_v10, %v456_v10  ;;  %v2585_v23 = vor.u32 %v2830_v12, %v2584_v7  ;;  %v2794_v26 = vld [vmem:[%s3230_s8 + $0x46c] sm:$0xf0]  ;;  %v2568_v27 = vld [vmem:[%s3230_s8 + $0x560] sm:$0xf]  ;;  %v1898_v55 = vld [vmem:[%s3230_s8 + $0x30] sm:$0xf0] }
  0x6d   : > { %1523 = vmatpush.bf16.msrb.mxu3 %v2109_v59  ;;  %v2826_v29 = vld [vmem:[%s3230_s8 + $0x56c] sm:$0xf0]  ;;  %v2441_v34 = vor.u32 %v2794_v26, %v2440_v25  ;;  %v2424_v37 = vld [vmem:[%s3230_s8 + $0x440] sm:$0xf]  ;;  %v2688_v56 = vld [vmem:[%s3230_s8 + $0x124] sm:$0xf]  ;;  %v1901_v63 = vor.u32 %v2656_v54, %v1898_v55 }
  0x6e   : > { %1485 = vmatpush.bf16.msrb.mxu0 %v2473_v0  ;;  %1465 = vmatmul.bf16.vlgmr.msra.gmra.mxu2 %v3334_v19  ;;  %v2569_v35 = vor.u32 %v2826_v29, %v2568_v27  ;;  %v2790_v38 = vld [vmem:[%s3230_s8 + $0x44c] sm:$0xf0]  ;;  %v2552_v39 = vld [vmem:[%s3230_s8 + $0x540] sm:$0xf]  ;;  %v2026_v57 = vld [vmem:[%s3230_s8 + $0x130] sm:$0xf0] }
  0x6f   : > { %1498 = vmatpush.bf16.msrb.mxu1 %v2601_v1  ;;  %1478 = vmatmul.bf16.vlgmr.msra.gmra.mxu3 %v3336_v20  ;;  %v2822_v41 = vld [vmem:[%s3230_s8 + $0x54c] sm:$0xf0]  ;;  %v2425_v46 = vor.u32 %v2790_v38, %v2424_v37  ;;  %v2408_v49 = vld [vmem:[%s3230_s8 + $0x420] sm:$0xf]  ;;  %v2652_v1 = vld [vmem:[%s3230_s8 + $0x4] sm:$0xf]  ;;  %v2029_v3 = vor.u32 %v2688_v56, %v2026_v57 }
  0x70   : > { %1511 = vmatpush.bf16.msrb.mxu2 %v1965_v4  ;;  %v2553_v47 = vor.u32 %v2822_v41, %v2552_v39  ;;  %v2786_v50 = vld [vmem:[%s3230_s8 + $0x42c] sm:$0xf0]  ;;  %v2536_v51 = vld [vmem:[%s3230_s8 + $0x520] sm:$0xf]  ;;  %v1882_v4 = vld [vmem:[%s3230_s8 + $0x10] sm:$0xf0] }
  0x71   : > { %1524 = vmatpush.bf16.msrb.mxu3 %v2093_v11  ;;  %v2818_v53 = vld [vmem:[%s3230_s8 + $0x52c] sm:$0xf0]  ;;  %v2409_v58 = vor.u32 %v2786_v50, %v2408_v49  ;;  %v2392_v59 = vld [vmem:[%s3230_s8 + $0x400] sm:$0xf]  ;;  %v2684_v5 = vld [vmem:[%s3230_s8 + $0x104] sm:$0xf]  ;;  %v1885_v16 = vor.u32 %v2652_v1, %v1882_v4 }
  0x72   : > { %1486 = vmatpush.bf16.msrb.mxu0 %v2457_v21  ;;  %v2782_v60 = vld [vmem:[%s3230_s8 + $0x40c] sm:$0xf0]  ;;  %v2520_v61 = vld [vmem:[%s3230_s8 + $0x500] sm:$0xf]  ;;  %v2537_v62 = vor.u32 %v2818_v53, %v2536_v51  ;;  %v2010_v6 = vld [vmem:[%s3230_s8 + $0x110] sm:$0xf0] }
  0x73   : > { %1499 = vmatpush.bf16.msrb.mxu1 %v2585_v23  ;;  %v2814_v0 = vld [vmem:[%s3230_s8 + $0x50c] sm:$0xf0]  ;;  %v2744_v7 = vld [vmem:[%s3230_s8 + $0x2e4] sm:$0xf]  ;;  %v2393_v10 = vor.u32 %v2782_v60, %v2392_v59  ;;  %v2378_v11 = vld [vmem:[%s3230_s8 + $0x3f0] sm:$0xf0]  ;;  %v458_v23 = vunpack.c.h.b16 %v247_v2 }
  0x74   : > { %1512 = vmatpush.bf16.msrb.mxu2 %v1949_v24  ;;  %v2776_v9 = vld [vmem:[%s3230_s8 + $0x3e4] sm:$0xf]  ;;  %v2506_v13 = vld [vmem:[%s3230_s8 + $0x4f0] sm:$0xf0]  ;;  %v2521_v15 = vor.u32 %v2814_v0, %v2520_v61  ;;  %v2013_v24 = vor.u32 %v2684_v5, %v2010_v6  ;;  %v2253_v25 = vor.u32 %v2744_v7, %v2250_v8 }
  0x75   : > { %1525 = vmatpush.bf16.msrb.mxu3 %v2077_v28  ;;  %v2808_v12 = vld [vmem:[%s3230_s8 + $0x4e4] sm:$0xf]  ;;  %v2634_v21 = vld [vmem:[%s3230_s8 + $0x5f0] sm:$0xf0]  ;;  %v2381_v26 = vor.u32 %v2776_v9, %v2378_v11  ;;  %v3394_v38 = vpack.c.b16 %v458_v23, %v458_v23 }
  0x76   : > { %1487 = vmatpush.bf16.msrb.mxu0 %v2441_v34  ;;  %v2840_v17 = vld [vmem:[%s3230_s8 + $0x5e4] sm:$0xf]  ;;  %v2509_v27 = vor.u32 %v2808_v12, %v2506_v13  ;;  %v2234_v29 = vld [vmem:[%s3230_s8 + $0x2d0] sm:$0xf0] }
  0x77   : > { %1500 = vmatpush.bf16.msrb.mxu1 %v2569_v35  ;;  %v2740_v28 = vld [vmem:[%s3230_s8 + $0x2c4] sm:$0xf]  ;;  %v2637_v31 = vor.u32 %v2840_v17, %v2634_v21  ;;  %v2362_v32 = vld [vmem:[%s3230_s8 + $0x3d0] sm:$0xf0]  ;;  %v3390_v35 = vpack.c.b16 %v457_v14, %v457_v14 }
  0x78   : > { %1513 = vmatpush.bf16.msrb.mxu2 %v1933_v36  ;;  %v2772_v30 = vld [vmem:[%s3230_s8 + $0x3c4] sm:$0xf]  ;;  %v2490_v34 = vld [vmem:[%s3230_s8 + $0x4d0] sm:$0xf0]  ;;  %v2237_v39 = vor.u32 %v2740_v28, %v2234_v29 }
  0x79   : > { %1526 = vmatpush.bf16.msrb.mxu3 %v2061_v40  ;;  %v2804_v33 = vld [vmem:[%s3230_s8 + $0x4c4] sm:$0xf]  ;;  %v2618_v37 = vld [vmem:[%s3230_s8 + $0x5d0] sm:$0xf0]  ;;  %v2365_v40 = vor.u32 %v2772_v30, %v2362_v32 }
  0x7a   : > { %1488 = vmatpush.bf16.msrb.mxu0 %v2425_v46  ;;  %v2836_v36 = vld [vmem:[%s3230_s8 + $0x5c4] sm:$0xf]  ;;  %v2493_v41 = vor.u32 %v2804_v33, %v2490_v34  ;;  %v2218_v43 = vld [vmem:[%s3230_s8 + $0x2b0] sm:$0xf0] }
  0x7b   : > { %1501 = vmatpush.bf16.msrb.mxu1 %v2553_v47  ;;  %v2736_v42 = vld [vmem:[%s3230_s8 + $0x2a4] sm:$0xf]  ;;  %v2621_v45 = vor.u32 %v2836_v36, %v2618_v37  ;;  %v2346_v46 = vld [vmem:[%s3230_s8 + $0x3b0] sm:$0xf0] }
  0x7c   : > { %1514 = vmatpush.bf16.msrb.mxu2 %v1917_v48  ;;  %v2768_v44 = vld [vmem:[%s3230_s8 + $0x3a4] sm:$0xf]  ;;  %v2474_v48 = vld [vmem:[%s3230_s8 + $0x4b0] sm:$0xf0]  ;;  %v2221_v51 = vor.u32 %v2736_v42, %v2218_v43 }
  0x7d   : > { %1527 = vmatpush.bf16.msrb.mxu3 %v2045_v52  ;;  %v2800_v47 = vld [vmem:[%s3230_s8 + $0x4a4] sm:$0xf]  ;;  %v2602_v50 = vld [vmem:[%s3230_s8 + $0x5b0] sm:$0xf0]  ;;  %v2349_v52 = vor.u32 %v2768_v44, %v2346_v46 }
  0x7e   : > { %1489 = vmatpush.bf16.msrb.mxu0 %v2409_v58  ;;  %v2832_v49 = vld [vmem:[%s3230_s8 + $0x5a4] sm:$0xf]  ;;  %v2477_v53 = vor.u32 %v2800_v47, %v2474_v48  ;;  %v2202_v55 = vld [vmem:[%s3230_s8 + $0x290] sm:$0xf0] }
  0x7f   : > { %1502 = vmatpush.bf16.msrb.mxu1 %v2537_v62  ;;  %v2732_v54 = vld [vmem:[%s3230_s8 + $0x284] sm:$0xf]  ;;  %v2605_v57 = vor.u32 %v2832_v49, %v2602_v50  ;;  %v2330_v58 = vld [vmem:[%s3230_s8 + $0x390] sm:$0xf0] }
  0x80   : > { %1515 = vmatpush.bf16.msrb.mxu2 %v1901_v63  ;;  %v2764_v56 = vld [vmem:[%s3230_s8 + $0x384] sm:$0xf]  ;;  %v2458_v60 = vld [vmem:[%s3230_s8 + $0x490] sm:$0xf0]  ;;  %v2205_v63 = vor.u32 %v2732_v54, %v2202_v55  ;;  %v2683_v54 = vld [vmem:[%s3230_s8 + $0xf4] sm:$0xf0] }
  0x81   : > { %1528 = vmatpush.bf16.msrb.mxu3 %v2029_v3  ;;  %v2796_v59 = vld [vmem:[%s3230_s8 + $0x484] sm:$0xf]  ;;  %v2586_v62 = vld [vmem:[%s3230_s8 + $0x590] sm:$0xf0]  ;;  %v2333_v0 = vor.u32 %v2764_v56, %v2330_v58  ;;  %v2128_v55 = vld [vmem:[%s3230_s8 + $0x1e8] sm:$0xf] }
  0x82   : > { %1490 = vmatpush.bf16.msrb.mxu0 %v2393_v10  ;;  %v2828_v61 = vld [vmem:[%s3230_s8 + $0x584] sm:$0xf]  ;;  %v2461_v1 = vor.u32 %v2796_v59, %v2458_v60  ;;  %v2186_v3 = vld [vmem:[%s3230_s8 + $0x270] sm:$0xf0]  ;;  %v2256_v58 = vld [vmem:[%s3230_s8 + $0x2e8] sm:$0xf] }
  0x83   : > { %1503 = vmatpush.bf16.msrb.mxu1 %v2521_v15  ;;  %v2728_v2 = vld [vmem:[%s3230_s8 + $0x264] sm:$0xf]  ;;  %v2589_v5 = vor.u32 %v2828_v61, %v2586_v62  ;;  %v2314_v6 = vld [vmem:[%s3230_s8 + $0x370] sm:$0xf0]  ;;  %v2747_v59 = vld [vmem:[%s3230_s8 + $0x2f4] sm:$0xf0] }
  0x84   : > { %1516 = vmatpush.bf16.msrb.mxu2 %v1885_v16  ;;  %v2760_v4 = vld [vmem:[%s3230_s8 + $0x364] sm:$0xf]  ;;  %v2442_v8 = vld [vmem:[%s3230_s8 + $0x470] sm:$0xf0]  ;;  %v2189_v11 = vor.u32 %v2728_v2, %v2186_v3  ;;  %v2384_v62 = vld [vmem:[%s3230_s8 + $0x3e8] sm:$0xf]  ;;  %v2257_v3 = vor.u32 %v2747_v59, %v2256_v58 }
  0x85   : > { %1529 = vmatpush.bf16.msrb.mxu3 %v2013_v24  ;;  %1491 = vmatmul.bf16.vlgmr.msrb.gmra.mxu0 %v3390_v35  ;;  %v2792_v7 = vld [vmem:[%s3230_s8 + $0x464] sm:$0xf]  ;;  %v2570_v10 = vld [vmem:[%s3230_s8 + $0x570] sm:$0xf0]  ;;  %v2317_v12 = vor.u32 %v2760_v4, %v2314_v6  ;;  %v1984_v4 = vld [vmem:[%s3230_s8 + $0xc8] sm:$0xf] }
  0x86   : > { %1535 = vmatpush.bf16.msra.mxu0 %v2253_v25  ;;  %1504 = vmatmul.bf16.vlgmr.msrb.gmra.mxu1 %v3394_v38  ;;  %v2824_v9 = vld [vmem:[%s3230_s8 + $0x564] sm:$0xf]  ;;  %v2445_v13 = vor.u32 %v2792_v7, %v2442_v8  ;;  %v2170_v15 = vld [vmem:[%s3230_s8 + $0x250] sm:$0xf0]  ;;  %v2112_v6 = vld [vmem:[%s3230_s8 + $0x1c8] sm:$0xf] }
  0x87   : > { %1548 = vmatpush.bf16.msra.mxu1 %v2381_v26  ;;  %1517 = vmatmul.bf16.vlgmr.msrb.gmra.mxu2 %v3332_v18  ;;  %v2724_v14 = vld [vmem:[%s3230_s8 + $0x244] sm:$0xf]  ;;  %v2573_v17 = vor.u32 %v2824_v9, %v2570_v10  ;;  %v2298_v21 = vld [vmem:[%s3230_s8 + $0x350] sm:$0xf0]  ;;  %v2711_v8 = vld [vmem:[%s3230_s8 + $0x1d4] sm:$0xf0] }
  0x88   : > { %1561 = vmatpush.bf16.msra.mxu2 %v2509_v27  ;;  %1530 = vmatmul.bf16.vlgmr.msrb.gmra.mxu3 %v3338_v22  ;;  %v2756_v16 = vld [vmem:[%s3230_s8 + $0x344] sm:$0xf]  ;;  %v2426_v24 = vld [vmem:[%s3230_s8 + $0x450] sm:$0xf0]  ;;  %v2173_v27 = vor.u32 %v2724_v14, %v2170_v15  ;;  %v2240_v9 = vld [vmem:[%s3230_s8 + $0x2c8] sm:$0xf]  ;;  %v2113_v14 = vor.u32 %v2711_v8, %v2112_v6 }
  0x89   : > { %1574 = vmatpush.bf16.msra.mxu3 %v2637_v31  ;;  %v2788_v23 = vld [vmem:[%s3230_s8 + $0x444] sm:$0xf]  ;;  %v2554_v26 = vld [vmem:[%s3230_s8 + $0x550] sm:$0xf0]  ;;  %v2301_v28 = vor.u32 %v2756_v16, %v2298_v21  ;;  %v2743_v10 = vld [vmem:[%s3230_s8 + $0x2d4] sm:$0xf0] }
  0x8a   : > { %1536 = vmatpush.bf16.msra.mxu0 %v2237_v39  ;;  %v2820_v25 = vld [vmem:[%s3230_s8 + $0x544] sm:$0xf]  ;;  %v2429_v29 = vor.u32 %v2788_v23, %v2426_v24  ;;  %v2154_v31 = vld [vmem:[%s3230_s8 + $0x230] sm:$0xf0]  ;;  %v2241_v15 = vor.u32 %v2743_v10, %v2240_v9  ;;  %v1968_v16 = vld [vmem:[%s3230_s8 + $0xa8] sm:$0xf] }
  0x8b   : > { %1549 = vmatpush.bf16.msra.mxu1 %v2365_v40  ;;  %v2720_v30 = vld [vmem:[%s3230_s8 + $0x224] sm:$0xf]  ;;  %v2557_v33 = vor.u32 %v2820_v25, %v2554_v26  ;;  %v2282_v34 = vld [vmem:[%s3230_s8 + $0x330] sm:$0xf0]  ;;  %v2096_v21 = vld [vmem:[%s3230_s8 + $0x1a8] sm:$0xf] }
  0x8c   : > { %1562 = vmatpush.bf16.msra.mxu2 %v2493_v41  ;;  %v2752_v32 = vld [vmem:[%s3230_s8 + $0x324] sm:$0xf]  ;;  %v2410_v37 = vld [vmem:[%s3230_s8 + $0x430] sm:$0xf0]  ;;  %v2157_v41 = vor.u32 %v2720_v30, %v2154_v31  ;;  %v2707_v24 = vld [vmem:[%s3230_s8 + $0x1b4] sm:$0xf0] }
  0x8d   : > { %1575 = vmatpush.bf16.msra.mxu3 %v2621_v45  ;;  %v2784_v36 = vld [vmem:[%s3230_s8 + $0x424] sm:$0xf]  ;;  %v2538_v40 = vld [vmem:[%s3230_s8 + $0x530] sm:$0xf0]  ;;  %v2285_v44 = vor.u32 %v2752_v32, %v2282_v34  ;;  %v2224_v25 = vld [vmem:[%s3230_s8 + $0x2a8] sm:$0xf]  ;;  %v2097_v30 = vor.u32 %v2707_v24, %v2096_v21 }
  0x8e   : > { %1537 = vmatpush.bf16.msra.mxu0 %v2221_v51  ;;  %v2816_v39 = vld [vmem:[%s3230_s8 + $0x524] sm:$0xf]  ;;  %v2138_v43 = vld [vmem:[%s3230_s8 + $0x210] sm:$0xf0]  ;;  %v2413_v45 = vor.u32 %v2784_v36, %v2410_v37  ;;  %v2739_v26 = vld [vmem:[%s3230_s8 + $0x2b4] sm:$0xf0] }
  0x8f   : > { %1550 = vmatpush.bf16.msra.mxu1 %v2349_v52  ;;  %v2716_v42 = vld [vmem:[%s3230_s8 + $0x204] sm:$0xf]  ;;  %v2266_v47 = vld [vmem:[%s3230_s8 + $0x310] sm:$0xf0]  ;;  %v2541_v49 = vor.u32 %v2816_v39, %v2538_v40  ;;  %v2225_v31 = vor.u32 %v2739_v26, %v2224_v25  ;;  %v1952_v32 = vld [vmem:[%s3230_s8 + $0x88] sm:$0xf] }
  0x90   : > { %1563 = vmatpush.bf16.msra.mxu2 %v2477_v53  ;;  %v2748_v46 = vld [vmem:[%s3230_s8 + $0x304] sm:$0xf]  ;;  %v2394_v50 = vld [vmem:[%s3230_s8 + $0x410] sm:$0xf0]  ;;  %v2000_v53 = vld [vmem:[%s3230_s8 + $0xe8] sm:$0xf]  ;;  %v2141_v56 = vor.u32 %v2716_v42, %v2138_v43 }
  0x91   : > { %1576 = vmatpush.bf16.msra.mxu3 %v2605_v57  ;;  %v2780_v48 = vld [vmem:[%s3230_s8 + $0x404] sm:$0xf]  ;;  %v2522_v52 = vld [vmem:[%s3230_s8 + $0x510] sm:$0xf0]  ;;  %v2715_v57 = vld [vmem:[%s3230_s8 + $0x1f4] sm:$0xf0]  ;;  %v2269_v60 = vor.u32 %v2748_v46, %v2266_v47 }
  0x92   : > { %1538 = vmatpush.bf16.msra.mxu0 %v2205_v63  ;;  %v2812_v51 = vld [vmem:[%s3230_s8 + $0x504] sm:$0xf]  ;;  %v2397_v61 = vor.u32 %v2780_v48, %v2394_v50  ;;  %v2779_v63 = vld [vmem:[%s3230_s8 + $0x3f4] sm:$0xf0]  ;;  %v2129_v2 = vor.u32 %v2715_v57, %v2128_v55  ;;  %v2080_v34 = vld [vmem:[%s3230_s8 + $0x188] sm:$0xf] }
  0x93   : > { %1551 = vmatpush.bf16.msra.mxu1 %v2333_v0  ;;  %v2525_v0 = vor.u32 %v2812_v51, %v2522_v52  ;;  %v2385_v7 = vor.u32 %v2779_v63, %v2384_v62  ;;  %v2703_v37 = vld [vmem:[%s3230_s8 + $0x194] sm:$0xf0]  ;;  %v2208_v39 = vld [vmem:[%s3230_s8 + $0x288] sm:$0xf] }
  0x94   : > { %1564 = vmatpush.bf16.msra.mxu2 %v2461_v1  ;;  %v2001_v1 = vor.u32 %v2683_v54, %v2000_v53  ;;  %v2735_v40 = vld [vmem:[%s3230_s8 + $0x294] sm:$0xf0]  ;;  %v1936_v46 = vld [vmem:[%s3230_s8 + $0x68] sm:$0xf] }
  0x95   : > { %1577 = vmatpush.bf16.msra.mxu3 %v2589_v5  ;;  %v2679_v5 = vld [vmem:[%s3230_s8 + $0xd4] sm:$0xf0]  ;;  %v2064_v48 = vld [vmem:[%s3230_s8 + $0x168] sm:$0xf] }
  0x96   : > { %1539 = vmatpush.bf16.msra.mxu0 %v2189_v11  ;;  %v2368_v11 = vld [vmem:[%s3230_s8 + $0x3c8] sm:$0xf]  ;;  %v2767_v42 = vld [vmem:[%s3230_s8 + $0x394] sm:$0xf0] }
  0x97   : > { %1552 = vmatpush.bf16.msra.mxu1 %v2317_v12  ;;  %v2775_v12 = vld [vmem:[%s3230_s8 + $0x3d4] sm:$0xf0]  ;;  %v2192_v51 = vld [vmem:[%s3230_s8 + $0x268] sm:$0xf] }
  0x98   : > { %1565 = vmatpush.bf16.msra.mxu2 %v2445_v13  ;;  %v1985_v13 = vor.u32 %v2679_v5, %v1984_v4  ;;  %v2369_v23 = vor.u32 %v2775_v12, %v2368_v11  ;;  %v2667_v47 = vld [vmem:[%s3230_s8 + $0x74] sm:$0xf0]  ;;  %v2320_v53 = vld [vmem:[%s3230_s8 + $0x368] sm:$0xf] }
  0x99   : > { %1578 = vmatpush.bf16.msra.mxu3 %v2573_v17  ;;  %v2675_v17 = vld [vmem:[%s3230_s8 + $0xb4] sm:$0xf0]  ;;  %v1937_v55 = vor.u32 %v2667_v47, %v1936_v46  ;;  %v1920_v58 = vld [vmem:[%s3230_s8 + $0x48] sm:$0xf] }
  0x9a   : > { %1540 = vmatpush.bf16.msra.mxu0 %v2173_v27  ;;  %v2352_v27 = vld [vmem:[%s3230_s8 + $0x3a8] sm:$0xf]  ;;  %v2699_v50 = vld [vmem:[%s3230_s8 + $0x174] sm:$0xf0] }
  0x9b   : > { %1553 = vmatpush.bf16.msra.mxu1 %v2301_v28  ;;  %v2771_v28 = vld [vmem:[%s3230_s8 + $0x3b4] sm:$0xf0]  ;;  %v2176_v63 = vld [vmem:[%s3230_s8 + $0x248] sm:$0xf] }
  0x9c   : > { %1566 = vmatpush.bf16.msra.mxu2 %v2429_v29  ;;  %v1969_v29 = vor.u32 %v2675_v17, %v1968_v16  ;;  %v2353_v36 = vor.u32 %v2771_v28, %v2352_v27  ;;  %v2731_v52 = vld [vmem:[%s3230_s8 + $0x274] sm:$0xf0]  ;;  %v1904_v6 = vld [vmem:[%s3230_s8 + $0x28] sm:$0xf] }
  0x9d   : > { %1579 = vmatpush.bf16.msra.mxu3 %v2557_v33  ;;  %v2671_v33 = vld [vmem:[%s3230_s8 + $0x94] sm:$0xf0]  ;;  %v2193_v57 = vor.u32 %v2731_v52, %v2192_v51  ;;  %v2032_v8 = vld [vmem:[%s3230_s8 + $0x128] sm:$0xf] }
  0x9e   : > { %1541 = vmatpush.bf16.msra.mxu0 %v2157_v41  ;;  %v2336_v41 = vld [vmem:[%s3230_s8 + $0x388] sm:$0xf]  ;;  %v1953_v43 = vor.u32 %v2671_v33, %v1952_v32  ;;  %v2763_v54 = vld [vmem:[%s3230_s8 + $0x374] sm:$0xf0] }
  0x9f   : > { %1554 = vmatpush.bf16.msra.mxu1 %v2285_v44  ;;  %v2081_v44 = vor.u32 %v2703_v37, %v2080_v34  ;;  %v2663_v59 = vld [vmem:[%s3230_s8 + $0x54] sm:$0xf0]  ;;  %v2160_v11 = vld [vmem:[%s3230_s8 + $0x228] sm:$0xf]  ;;  %v2681_v37 = vld [vmem:[%s3230_s8 + $0xec] sm:$0xf] }
  0xa0   : > { %1567 = vmatpush.bf16.msra.mxu2 %v2413_v45  ;;  %v2209_v45 = vor.u32 %v2735_v40, %v2208_v39  ;;  %v2695_v62 = vld [vmem:[%s3230_s8 + $0x154] sm:$0xf0]  ;;  %v1888_v16 = vld [vmem:[%s3230_s8 + $0x8] sm:$0xf]  ;;  %v2002_v39 = vld [vmem:[%s3230_s8 + $0xf8] sm:$0xf0] }
  0xa1   : > { %1580 = vmatpush.bf16.msra.mxu3 %v2541_v49  ;;  %v2337_v49 = vor.u32 %v2767_v42, %v2336_v41  ;;  %v2691_v10 = vld [vmem:[%s3230_s8 + $0x134] sm:$0xf0]  ;;  %v2016_v24 = vld [vmem:[%s3230_s8 + $0x108] sm:$0xf]  ;;  %v2713_v42 = vld [vmem:[%s3230_s8 + $0x1ec] sm:$0xf]  ;;  %v2005_v47 = vor.u32 %v2681_v37, %v2002_v39 }
  0xa2   : > { %1542 = vmatpush.bf16.msra.mxu0 %v2141_v56  ;;  %v2065_v56 = vor.u32 %v2699_v50, %v2064_v48  ;;  %v2723_v12 = vld [vmem:[%s3230_s8 + $0x234] sm:$0xf0]  ;;  %v2033_v21 = vor.u32 %v2691_v10, %v2032_v8  ;;  %v2144_v26 = vld [vmem:[%s3230_s8 + $0x208] sm:$0xf] }
  0xa3   : > { %1555 = vmatpush.bf16.msra.mxu1 %v2269_v60  ;;  %v2048_v60 = vld [vmem:[%s3230_s8 + $0x148] sm:$0xf]  ;;  %v2655_v17 = vld [vmem:[%s3230_s8 + $0x14] sm:$0xf0] }
  0xa4   : > { %1568 = vmatpush.bf16.msra.mxu2 %v2397_v61  ;;  %v2321_v61 = vor.u32 %v2763_v54, %v2320_v53  ;;  %v2049_v4 = vor.u32 %v2695_v62, %v2048_v60  ;;  %v2687_v25 = vld [vmem:[%s3230_s8 + $0x114] sm:$0xf0]  ;;  %v2640_v33 = vld [vmem:[%s3230_s8 + $0x5e8] sm:$0xf]  ;;  %v1889_v34 = vor.u32 %v2655_v17, %v1888_v16  ;;  %v2677_v53 = vld [vmem:[%s3230_s8 + $0xcc] sm:$0xf] }
  0xa5   : > { %1581 = vmatpush.bf16.msra.mxu3 %v2525_v0  ;;  %1543 = vmatmul.bf16.vlgmr.msra.gmra.mxu0 %v3334_v19  ;;  %v2727_v0 = vld [vmem:[%s3230_s8 + $0x254] sm:$0xf0]  ;;  %v2017_v40 = vor.u32 %v2687_v25, %v2016_v24  ;;  %v2496_v48 = vld [vmem:[%s3230_s8 + $0x4c8] sm:$0xf]  ;;  %v1986_v54 = vld [vmem:[%s3230_s8 + $0xd8] sm:$0xf0] }
  0xa6   : > { %1587 = vmatpush.bf16.msrb.mxu0 %v2001_v1  ;;  %1556 = vmatmul.bf16.vlgmr.msra.gmra.mxu1 %v3336_v20  ;;  %v2304_v1 = vld [vmem:[%s3230_s8 + $0x348] sm:$0xf]  ;;  %v2177_v5 = vor.u32 %v2727_v0, %v2176_v63  ;;  %v2719_v28 = vld [vmem:[%s3230_s8 + $0x214] sm:$0xf0]  ;;  %v2082_v16 = vld [vmem:[%s3230_s8 + $0x198] sm:$0xf0] }
  0xa7   : > { %1600 = vmatpush.bf16.msrb.mxu1 %v2129_v2  ;;  %1569 = vmatmul.bf16.vlgmr.msra.gmra.mxu2 %v3390_v35  ;;  %v2759_v2 = vld [vmem:[%s3230_s8 + $0x354] sm:$0xf0]  ;;  %v2145_v41 = vor.u32 %v2719_v28, %v2144_v26  ;;  %v2624_v50 = vld [vmem:[%s3230_s8 + $0x5c8] sm:$0xf] }
  0xa8   : > { %1613 = vmatpush.bf16.msrb.mxu2 %v2257_v3  ;;  %1582 = vmatmul.bf16.vlgmr.msra.gmra.mxu3 %v3394_v38  ;;  %v1921_v3 = vor.u32 %v2663_v59, %v1920_v58  ;;  %v2305_v9 = vor.u32 %v2759_v2, %v2304_v1  ;;  %v2811_v32 = vld [vmem:[%s3230_s8 + $0x4f4] sm:$0xf0]  ;;  %v1989_v59 = vor.u32 %v2677_v53, %v1986_v54  ;;  %v2480_v60 = vld [vmem:[%s3230_s8 + $0x4a8] sm:$0xf]  ;;  %v2673_v1 = vld [vmem:[%s3230_s8 + $0xac] sm:$0xf] }
  0xa9   : > { %1626 = vmatpush.bf16.msrb.mxu3 %v2385_v7  ;;  %v2659_v7 = vld [vmem:[%s3230_s8 + $0x34] sm:$0xf0]  ;;  %v2608_v62 = vld [vmem:[%s3230_s8 + $0x5a8] sm:$0xf]  ;;  %v1970_v2 = vld [vmem:[%s3230_s8 + $0xb8] sm:$0xf0] }
  0xaa   : > { %1588 = vmatpush.bf16.msrb.mxu0 %v1985_v13  ;;  %v2288_v13 = vld [vmem:[%s3230_s8 + $0x328] sm:$0xf]  ;;  %v2839_v52 = vld [vmem:[%s3230_s8 + $0x5d4] sm:$0xf0] }
  0xab   : > { %1601 = vmatpush.bf16.msrb.mxu1 %v2113_v14  ;;  %v2755_v14 = vld [vmem:[%s3230_s8 + $0x334] sm:$0xf0]  ;;  %v2625_v58 = vor.u32 %v2839_v52, %v2624_v50  ;;  %v2464_v8 = vld [vmem:[%s3230_s8 + $0x488] sm:$0xf] }
  0xac   : > { %1614 = vmatpush.bf16.msrb.mxu2 %v2241_v15  ;;  %v1905_v15 = vor.u32 %v2659_v7, %v1904_v6  ;;  %v2289_v27 = vor.u32 %v2755_v14, %v2288_v13  ;;  %v2835_v0 = vld [vmem:[%s3230_s8 + $0x5b4] sm:$0xf0]  ;;  %v1973_v7 = vor.u32 %v2673_v1, %v1970_v2  ;;  %v2592_v10 = vld [vmem:[%s3230_s8 + $0x588] sm:$0xf]  ;;  %v2669_v13 = vld [vmem:[%s3230_s8 + $0x8c] sm:$0xf] }
  0xad   : > { %1627 = vmatpush.bf16.msrb.mxu3 %v2369_v23  ;;  %v2161_v23 = vor.u32 %v2723_v12, %v2160_v11  ;;  %v2609_v6 = vor.u32 %v2835_v0, %v2608_v62  ;;  %v2831_v12 = vld [vmem:[%s3230_s8 + $0x594] sm:$0xf0]  ;;  %v1954_v14 = vld [vmem:[%s3230_s8 + $0x98] sm:$0xf0]  ;;  %v2448_v24 = vld [vmem:[%s3230_s8 + $0x468] sm:$0xf] }
  0xae   : > { %1589 = vmatpush.bf16.msrb.mxu0 %v1969_v29  ;;  %v2272_v29 = vld [vmem:[%s3230_s8 + $0x308] sm:$0xf]  ;;  %v2795_v25 = vld [vmem:[%s3230_s8 + $0x474] sm:$0xf0]  ;;  %v2653_v2 = vld [vmem:[%s3230_s8 + $0xc] sm:$0xf] }
  0xaf   : > { %1602 = vmatpush.bf16.msrb.mxu1 %v2097_v30  ;;  %v2751_v30 = vld [vmem:[%s3230_s8 + $0x314] sm:$0xf0]  ;;  %v2576_v26 = vld [vmem:[%s3230_s8 + $0x568] sm:$0xf] }
  0xb0   : > { %1615 = vmatpush.bf16.msrb.mxu2 %v2225_v31  ;;  %v2512_v31 = vld [vmem:[%s3230_s8 + $0x4e8] sm:$0xf]  ;;  %v2827_v28 = vld [vmem:[%s3230_s8 + $0x574] sm:$0xf0] }
  0xb1   : > { %1628 = vmatpush.bf16.msrb.mxu3 %v2353_v36  ;;  %v2843_v36 = vld [vmem:[%s3230_s8 + $0x5f4] sm:$0xf0]  ;;  %v2432_v37 = vld [vmem:[%s3230_s8 + $0x448] sm:$0xf] }
  0xb2   : > { %1590 = vmatpush.bf16.msrb.mxu0 %v1953_v43  ;;  %v2130_v43 = vld [vmem:[%s3230_s8 + $0x1f8] sm:$0xf0]  ;;  %v2641_v46 = vor.u32 %v2843_v36, %v2640_v33  ;;  %v2449_v33 = vor.u32 %v2795_v25, %v2448_v24  ;;  %v2791_v39 = vld [vmem:[%s3230_s8 + $0x454] sm:$0xf0]  ;;  %v2416_v50 = vld [vmem:[%s3230_s8 + $0x428] sm:$0xf] }
  0xb3   : > { %1603 = vmatpush.bf16.msrb.mxu1 %v2081_v44  ;;  %v2273_v44 = vor.u32 %v2751_v30, %v2272_v29  ;;  %v2133_v51 = vor.u32 %v2713_v42, %v2130_v43  ;;  %v2665_v29 = vld [vmem:[%s3230_s8 + $0x6c] sm:$0xf]  ;;  %v1938_v30 = vld [vmem:[%s3230_s8 + $0x78] sm:$0xf0]  ;;  %v2823_v42 = vld [vmem:[%s3230_s8 + $0x554] sm:$0xf0] }
  0xb4   : > { %1616 = vmatpush.bf16.msrb.mxu2 %v2209_v45  ;;  %v2513_v45 = vor.u32 %v2811_v32, %v2512_v31  ;;  %v2697_v31 = vld [vmem:[%s3230_s8 + $0x16c] sm:$0xf]  ;;  %v2066_v32 = vld [vmem:[%s3230_s8 + $0x178] sm:$0xf0]  ;;  %v1941_v36 = vor.u32 %v2665_v29, %v1938_v30  ;;  %v2544_v52 = vld [vmem:[%s3230_s8 + $0x528] sm:$0xf] }
  0xb5   : > { %1629 = vmatpush.bf16.msrb.mxu3 %v2337_v49  ;;  %v2807_v49 = vld [vmem:[%s3230_s8 + $0x4d4] sm:$0xf0]  ;;  %v2661_v43 = vld [vmem:[%s3230_s8 + $0x4c] sm:$0xf]  ;;  %v2528_v0 = vld [vmem:[%s3230_s8 + $0x508] sm:$0xf] }
  0xb6   : > { %1591 = vmatpush.bf16.msrb.mxu0 %v1937_v55  ;;  %v2709_v55 = vld [vmem:[%s3230_s8 + $0x1cc] sm:$0xf]  ;;  %v2819_v54 = vld [vmem:[%s3230_s8 + $0x534] sm:$0xf0]  ;;  %v2370_v30 = vld [vmem:[%s3230_s8 + $0x3d8] sm:$0xf0] }
  0xb7   : > { %1604 = vmatpush.bf16.msrb.mxu1 %v2065_v56  ;;  %v2114_v56 = vld [vmem:[%s3230_s8 + $0x1d8] sm:$0xf0]  ;;  %v2545_v62 = vor.u32 %v2819_v54, %v2544_v52  ;;  %v2815_v1 = vld [vmem:[%s3230_s8 + $0x514] sm:$0xf0]  ;;  %v2733_v52 = vld [vmem:[%s3230_s8 + $0x28c] sm:$0xf] }
  0xb8   : > { %1617 = vmatpush.bf16.msrb.mxu2 %v2193_v57  ;;  %v2497_v57 = vor.u32 %v2807_v49, %v2496_v48  ;;  %v2117_v63 = vor.u32 %v2709_v55, %v2114_v56  ;;  %v2657_v55 = vld [vmem:[%s3230_s8 + $0x2c] sm:$0xf]  ;;  %v1906_v56 = vld [vmem:[%s3230_s8 + $0x38] sm:$0xf0] }
  0xb9   : > { %1630 = vmatpush.bf16.msrb.mxu3 %v2321_v61  ;;  %v2803_v61 = vld [vmem:[%s3230_s8 + $0x4b4] sm:$0xf0]  ;;  %v2338_v54 = vld [vmem:[%s3230_s8 + $0x398] sm:$0xf0] }
  0xba   : > { %1592 = vmatpush.bf16.msrb.mxu0 %v1921_v3  ;;  %v2705_v3 = vld [vmem:[%s3230_s8 + $0x1ac] sm:$0xf] }
  0xbb   : > { %1605 = vmatpush.bf16.msrb.mxu1 %v2049_v4  ;;  %v2098_v4 = vld [vmem:[%s3230_s8 + $0x1b8] sm:$0xf0] }
  0xbc   : > { %1618 = vmatpush.bf16.msrb.mxu2 %v2177_v5  ;;  %v2481_v5 = vor.u32 %v2803_v61, %v2480_v60  ;;  %v2101_v11 = vor.u32 %v2705_v3, %v2098_v4  ;;  %v2400_v60 = vld [vmem:[%s3230_s8 + $0x408] sm:$0xf]  ;;  %v2783_v61 = vld [vmem:[%s3230_s8 + $0x414] sm:$0xf0]  ;;  %v1890_v4 = vld [vmem:[%s3230_s8 + $0x18] sm:$0xf0] }
  0xbd   : > { %1631 = vmatpush.bf16.msrb.mxu3 %v2305_v9  ;;  %v2799_v9 = vld [vmem:[%s3230_s8 + $0x494] sm:$0xf0] }
  0xbe   : > { %1593 = vmatpush.bf16.msrb.mxu0 %v1905_v15  ;;  %v2701_v15 = vld [vmem:[%s3230_s8 + $0x18c] sm:$0xf]  ;;  %v2465_v17 = vor.u32 %v2799_v9, %v2464_v8  ;;  %v2258_v8 = vld [vmem:[%s3230_s8 + $0x2f8] sm:$0xf0] }
  0xbf   : > { %1606 = vmatpush.bf16.msrb.mxu1 %v2033_v21  ;;  %v2593_v21 = vor.u32 %v2831_v12, %v2592_v10  ;;  %v2777_v9 = vld [vmem:[%s3230_s8 + $0x3ec] sm:$0xf]  ;;  %v2401_v10 = vor.u32 %v2783_v61, %v2400_v60 }
  0xc0   : > { %1619 = vmatpush.bf16.msrb.mxu2 %v2161_v23  ;;  %v1957_v23 = vor.u32 %v2669_v13, %v1954_v14  ;;  %v2809_v12 = vld [vmem:[%s3230_s8 + $0x4ec] sm:$0xf]  ;;  %v2514_v13 = vld [vmem:[%s3230_s8 + $0x4f8] sm:$0xf0]  ;;  %v2529_v14 = vor.u32 %v2815_v1, %v2528_v0 }
  0xc1   : > { %1632 = vmatpush.bf16.msrb.mxu3 %v2289_v27  ;;  %v2085_v27 = vor.u32 %v2701_v15, %v2082_v16  ;;  %v1893_v15 = vor.u32 %v2653_v2, %v1890_v4  ;;  %v2841_v16 = vld [vmem:[%s3230_s8 + $0x5ec] sm:$0xf]  ;;  %v2517_v25 = vor.u32 %v2809_v12, %v2514_v13  ;;  %v2322_v2 = vld [vmem:[%s3230_s8 + $0x378] sm:$0xf0] }
  0xc2   : > { %1594 = vmatpush.bf16.msrb.mxu0 %v1889_v34  ;;  %v2577_v34 = vor.u32 %v2827_v28, %v2576_v26  ;;  %v2741_v26 = vld [vmem:[%s3230_s8 + $0x2cc] sm:$0xf]  ;;  %v2450_v4 = vld [vmem:[%s3230_s8 + $0x478] sm:$0xf0] }
  0xc3   : > { %1607 = vmatpush.bf16.msrb.mxu1 %v2017_v40  ;;  %v2560_v40 = vld [vmem:[%s3230_s8 + $0x548] sm:$0xf]  ;;  %v2773_v28 = vld [vmem:[%s3230_s8 + $0x3cc] sm:$0xf] }
  0xc4   : > { %1620 = vmatpush.bf16.msrb.mxu2 %v2145_v41  ;;  %v2069_v41 = vor.u32 %v2697_v31, %v2066_v32  ;;  %v2561_v48 = vor.u32 %v2823_v42, %v2560_v40  ;;  %v2805_v31 = vld [vmem:[%s3230_s8 + $0x4cc] sm:$0xf]  ;;  %v2498_v32 = vld [vmem:[%s3230_s8 + $0x4d8] sm:$0xf0] }
  0xc5   : > { %1633 = vmatpush.bf16.msrb.mxu3 %v2273_v44  ;;  %1595 = vmatmul.bf16.vlgmr.msrb.gmra.mxu0 %v3332_v18  ;;  %v1922_v44 = vld [vmem:[%s3230_s8 + $0x58] sm:$0xf0]  ;;  %v2737_v40 = vld [vmem:[%s3230_s8 + $0x2ac] sm:$0xf] }
  0xc6   : > { %1639 = vmatpush.bf16.msra.mxu0 %v2513_v45  ;;  %1608 = vmatmul.bf16.vlgmr.msrb.gmra.mxu1 %v3338_v22  ;;  %v2693_v45 = vld [vmem:[%s3230_s8 + $0x14c] sm:$0xf]  ;;  %v1925_v49 = vor.u32 %v2661_v43, %v1922_v44  ;;  %v2354_v44 = vld [vmem:[%s3230_s8 + $0x3b8] sm:$0xf0] }
  0xc7   : > { %1652 = vmatpush.bf16.msra.mxu1 %v2641_v46  ;;  %1621 = vmatmul.bf16.vlgmr.msrb.gmra.mxu2 %v3334_v19  ;;  %v2050_v46 = vld [vmem:[%s3230_s8 + $0x158] sm:$0xf0]  ;;  %v2769_v42 = vld [vmem:[%s3230_s8 + $0x3ac] sm:$0xf] }
  0xc8   : > { %1665 = vmatpush.bf16.msra.mxu2 %v2005_v47  ;;  %1634 = vmatmul.bf16.vlgmr.msrb.gmra.mxu3 %v3336_v20  ;;  %v2433_v47 = vor.u32 %v2791_v39, %v2432_v37  ;;  %v2053_v53 = vor.u32 %v2693_v45, %v2050_v46  ;;  %v2373_v37 = vor.u32 %v2773_v28, %v2370_v30  ;;  %v2801_v45 = vld [vmem:[%s3230_s8 + $0x4ac] sm:$0xf]  ;;  %v2482_v46 = vld [vmem:[%s3230_s8 + $0x4b8] sm:$0xf0] }
  0xc9   : > { %1678 = vmatpush.bf16.msra.mxu3 %v2133_v51  ;;  %v2787_v51 = vld [vmem:[%s3230_s8 + $0x434] sm:$0xf0]  ;;  %v2501_v39 = vor.u32 %v2805_v31, %v2498_v32  ;;  %v2761_v0 = vld [vmem:[%s3230_s8 + $0x36c] sm:$0xf]  ;;  %v2290_v31 = vld [vmem:[%s3230_s8 + $0x338] sm:$0xf0] }
  0xca   : > { %1640 = vmatpush.bf16.msra.mxu0 %v2497_v57  ;;  %v2689_v57 = vld [vmem:[%s3230_s8 + $0x12c] sm:$0xf] }
  0xcb   : > { %1653 = vmatpush.bf16.msra.mxu1 %v2625_v58  ;;  %v2034_v58 = vld [vmem:[%s3230_s8 + $0x138] sm:$0xf0]  ;;  %v2757_v12 = vld [vmem:[%s3230_s8 + $0x34c] sm:$0xf] }
  0xcc   : > { %1666 = vmatpush.bf16.msra.mxu2 %v1989_v59  ;;  %v2417_v59 = vor.u32 %v2787_v51, %v2416_v50  ;;  %v2037_v3 = vor.u32 %v2689_v57, %v2034_v58  ;;  %v2357_v50 = vor.u32 %v2769_v42, %v2354_v44  ;;  %v2485_v51 = vor.u32 %v2801_v45, %v2482_v46  ;;  %v2829_v57 = vld [vmem:[%s3230_s8 + $0x58c] sm:$0xf]  ;;  %v2594_v58 = vld [vmem:[%s3230_s8 + $0x598] sm:$0xf0] }
  0xcd   : > { %1679 = vmatpush.bf16.msra.mxu3 %v2117_v63  ;;  %v1909_v63 = vor.u32 %v2657_v55, %v1906_v56  ;;  %v2797_v55 = vld [vmem:[%s3230_s8 + $0x48c] sm:$0xf]  ;;  %v2466_v56 = vld [vmem:[%s3230_s8 + $0x498] sm:$0xf0]  ;;  %v2597_v1 = vor.u32 %v2829_v57, %v2594_v58 }
  0xce   : > { %1641 = vmatpush.bf16.msra.mxu0 %v2481_v5  ;;  %v2685_v5 = vld [vmem:[%s3230_s8 + $0x10c] sm:$0xf]  ;;  %v2469_v61 = vor.u32 %v2797_v55, %v2466_v56  ;;  %v2146_v45 = vld [vmem:[%s3230_s8 + $0x218] sm:$0xf0] }
  0xcf   : > { %1654 = vmatpush.bf16.msra.mxu1 %v2609_v6  ;;  %v2018_v6 = vld [vmem:[%s3230_s8 + $0x118] sm:$0xf0]  ;;  %v2753_v30 = vld [vmem:[%s3230_s8 + $0x32c] sm:$0xf] }
  0xd0   : > { %1667 = vmatpush.bf16.msra.mxu2 %v1973_v7  ;;  %v2745_v7 = vld [vmem:[%s3230_s8 + $0x2ec] sm:$0xf]  ;;  %v2293_v42 = vor.u32 %v2753_v30, %v2290_v31 }
  0xd1   : > { %1680 = vmatpush.bf16.msra.mxu3 %v2101_v11  ;;  %v2386_v11 = vld [vmem:[%s3230_s8 + $0x3f8] sm:$0xf0]  ;;  %v2717_v44 = vld [vmem:[%s3230_s8 + $0x20c] sm:$0xf] }
  0xd2   : > { %1642 = vmatpush.bf16.msra.mxu0 %v2465_v17  ;;  %v2642_v17 = vld [vmem:[%s3230_s8 + $0x5f8] sm:$0xf0]  ;;  %v2389_v24 = vor.u32 %v2777_v9, %v2386_v11  ;;  %v2749_v46 = vld [vmem:[%s3230_s8 + $0x30c] sm:$0xf]  ;;  %v2149_v55 = vor.u32 %v2717_v44, %v2146_v45 }
  0xd3   : > { %1655 = vmatpush.bf16.msra.mxu1 %v2593_v21  ;;  %v2021_v21 = vor.u32 %v2685_v5, %v2018_v6  ;;  %v2645_v29 = vor.u32 %v2841_v16, %v2642_v17  ;;  %v2825_v5 = vld [vmem:[%s3230_s8 + $0x56c] sm:$0xf]  ;;  %v2578_v6 = vld [vmem:[%s3230_s8 + $0x578] sm:$0xf0] }
  0xd4   : > { %1668 = vmatpush.bf16.msra.mxu2 %v1957_v23  ;;  %v2261_v23 = vor.u32 %v2745_v7, %v2258_v8  ;;  %v2325_v8 = vor.u32 %v2761_v0, %v2322_v2  ;;  %v2178_v11 = vld [vmem:[%s3230_s8 + $0x258] sm:$0xf0]  ;;  %v2581_v13 = vor.u32 %v2825_v5, %v2578_v6  ;;  %v2821_v17 = vld [vmem:[%s3230_s8 + $0x54c] sm:$0xf] }
  0xd5   : > { %1681 = vmatpush.bf16.msra.mxu3 %v2085_v27  ;;  %v2242_v27 = vld [vmem:[%s3230_s8 + $0x2d8] sm:$0xf0] }
  0xd6   : > { %1643 = vmatpush.bf16.msra.mxu0 %v2449_v33  ;;  %v2837_v33 = vld [vmem:[%s3230_s8 + $0x5cc] sm:$0xf]  ;;  %v2434_v16 = vld [vmem:[%s3230_s8 + $0x458] sm:$0xf0] }
  0xd7   : > { %1656 = vmatpush.bf16.msra.mxu1 %v2577_v34  ;;  %v2626_v34 = vld [vmem:[%s3230_s8 + $0x5d8] sm:$0xf0] }
  0xd8   : > { %1669 = vmatpush.bf16.msra.mxu2 %v1941_v36  ;;  %v2245_v36 = vor.u32 %v2741_v26, %v2242_v27  ;;  %v2629_v43 = vor.u32 %v2837_v33, %v2626_v34  ;;  %v2721_v26 = vld [vmem:[%s3230_s8 + $0x22c] sm:$0xf] }
  0xd9   : > { %1682 = vmatpush.bf16.msra.mxu3 %v2069_v41  ;;  %v2226_v41 = vld [vmem:[%s3230_s8 + $0x2b8] sm:$0xf0]  ;;  %v2785_v34 = vld [vmem:[%s3230_s8 + $0x42c] sm:$0xf] }
  0xda   : > { %1644 = vmatpush.bf16.msra.mxu0 %v2433_v47  ;;  %v2833_v47 = vld [vmem:[%s3230_s8 + $0x5ac] sm:$0xf] }
  0xdb   : > { %1657 = vmatpush.bf16.msra.mxu1 %v2561_v48  ;;  %v2610_v48 = vld [vmem:[%s3230_s8 + $0x5b8] sm:$0xf0] }
  0xdc   : > { %1670 = vmatpush.bf16.msra.mxu2 %v1925_v49  ;;  %v2229_v49 = vor.u32 %v2737_v40, %v2226_v41  ;;  %v2546_v40 = vld [vmem:[%s3230_s8 + $0x538] sm:$0xf0] }
  0xdd   : > { %1683 = vmatpush.bf16.msra.mxu3 %v2053_v53  ;;  %v2765_v53 = vld [vmem:[%s3230_s8 + $0x38c] sm:$0xf] }
  0xde   : > { %1645 = vmatpush.bf16.msra.mxu0 %v2417_v59  ;;  %v2341_v60 = vor.u32 %v2765_v53, %v2338_v54  ;;  %v2813_v53 = vld [vmem:[%s3230_s8 + $0x50c] sm:$0xf] }
  0xdf   : > { %1658 = vmatpush.bf16.msra.mxu1 %v2545_v62  ;;  %v2729_v62 = vld [vmem:[%s3230_s8 + $0x26c] sm:$0xf] }
  0xe0   : > { %1671 = vmatpush.bf16.msra.mxu2 %v1909_v63  ;;  %v2194_v63 = vld [vmem:[%s3230_s8 + $0x278] sm:$0xf0] }
  0xe1   : > { %1684 = vmatpush.bf16.msra.mxu3 %v2037_v3  ;;  %v2793_v3 = vld [vmem:[%s3230_s8 + $0x46c] sm:$0xf]  ;;  %v2197_v7 = vor.u32 %v2729_v62, %v2194_v63 }
  0xe2   : > { %1646 = vmatpush.bf16.msra.mxu0 %v2401_v10  ;;  %v2453_v9 = vor.u32 %v2793_v3, %v2450_v4  ;;  %v2725_v10 = vld [vmem:[%s3230_s8 + $0x24c] sm:$0xf] }
  0xe3   : > { %1659 = vmatpush.bf16.msra.mxu1 %v2529_v14  ;;  %v2306_v14 = vld [vmem:[%s3230_s8 + $0x358] sm:$0xf0]  ;;  %v1453_v32 = vpop.f32.mrf.mxu1 }
  0xe4   : > { %1672 = vmatpush.bf16.msra.mxu2 %v1893_v15  ;;  %v2789_v15 = vld [vmem:[%s3230_s8 + $0x44c] sm:$0xf]  ;;  %v2309_v27 = vor.u32 %v2757_v12, %v2306_v14 }
  0xe5   : > { %1685 = vmatpush.bf16.msra.mxu3 %v2021_v21  ;;  %1647 = vmatmul.bf16.vlgmr.msra.gmra.mxu0 %v3390_v35  ;;  %v2562_v21 = vld [vmem:[%s3230_s8 + $0x558] sm:$0xf0]  ;;  %v2437_v28 = vor.u32 %v2789_v15, %v2434_v16 }
  0xe6   : > { %1691 = vmatpush.bf16.msrb.mxu0 %v2261_v23  ;;  %1660 = vmatmul.bf16.vlgmr.msra.gmra.mxu1 %v3394_v38  ;;  %v3639_v23 = vld [vmem:[%s213_s24] sm:$0xf]  ;;  %v2565_v33 = vor.u32 %v2821_v17, %v2562_v21 }
  0xe7   : > { %1704 = vmatpush.bf16.msrb.mxu1 %v2389_v24  ;;  %1673 = vmatmul.bf16.vlgmr.msra.gmra.mxu2 %v3332_v18  ;;  %v2210_v18 = vld [vmem:[%s3230_s8 + $0x298] sm:$0xf0]  ;;  %v1440_v24 = vpop.f32.mrf.mxu0 }
  0xe8   : > { %1717 = vmatpush.bf16.msrb.mxu2 %v2517_v25  ;;  %1686 = vmatmul.bf16.vlgmr.msra.gmra.mxu3 %v3338_v22  ;;  %v2613_v22 = vor.u32 %v2833_v47, %v2610_v48  ;;  %v2213_v59 = vor.u32 %v2733_v52, %v2210_v18  ;;  %v2181_v25 = vor.u32 %v2725_v10, %v2178_v11  ;;  %v2274_v48 = vld [vmem:[%s3230_s8 + $0x318] sm:$0xf0] }
  0xe9   : > { %1730 = vmatpush.bf16.msrb.mxu3 %v2645_v29  ;;  %v2162_v29 = vld [vmem:[%s3230_s8 + $0x238] sm:$0xf0]  ;;  %v2277_v56 = vor.u32 %v2749_v46, %v2274_v48 }
  0xea   : > { %1692 = vmatpush.bf16.msrb.mxu0 %v2245_v36  ;;  %v2418_v36 = vld [vmem:[%s3230_s8 + $0x438] sm:$0xf0]  ;;  %v2165_v41 = vor.u32 %v2721_v26, %v2162_v29 }
  0xeb   : > { %1705 = vmatpush.bf16.msrb.mxu1 %v2373_v37  ;;  %v442_v37 = vperm.slane %v3639_v23, 0  ;;  %v1455_v58 = vpop.f32.mrf.mxu1 }
  0xec   : > { %1718 = vmatpush.bf16.msrb.mxu2 %v2501_v39  ;;  %v2817_v39 = vld [vmem:[%s3230_s8 + $0x52c] sm:$0xf] }
  0xed   : > { %1731 = vmatpush.bf16.msrb.mxu3 %v2629_v43  ;;  %v2421_v43 = vor.u32 %v2785_v34, %v2418_v36  ;;  %v2549_v47 = vor.u32 %v2817_v39, %v2546_v40 }
  0xee   : > { %1693 = vmatpush.bf16.msrb.mxu0 %v2229_v49  ;;  %v2781_v49 = vld [vmem:[%s3230_s8 + $0x40c] sm:$0xf] }
  0xef   : > { %1706 = vmatpush.bf16.msrb.mxu1 %v2357_v50  ;;  %v2402_v50 = vld [vmem:[%s3230_s8 + $0x418] sm:$0xf0]  ;;  %v1442_v54 = vpop.f32.mrf.mxu0 }
  0xf0   : > { %1719 = vmatpush.bf16.msrb.mxu2 %v2485_v51  ;;  %v1441_v51 = vadd.f32 %v1440_v24, %v442_v37  ;;  %v2405_v57 = vor.u32 %v2781_v49, %v2402_v50 }
  0xf1   : > { %1732 = vmatpush.bf16.msrb.mxu3 %v2613_v22  ;;  %v1466_v52 = vpop.f32.mrf.mxu2  ;;  %v2530_v22 = vld [vmem:[%s3230_s8 + $0x518] sm:$0xf0] }
  0xf2   : > { %1694 = vmatpush.bf16.msrb.mxu0 %v2213_v59  ;;  %v1479_v18 = vpop.f32.mrf.mxu3  ;;  %v2533_v59 = vor.u32 %v2813_v53, %v2530_v22 }
  0xf3   : > { %1707 = vmatpush.bf16.msrb.mxu1 %v2341_v60  ;;  %v1454_v60 = vadd.f32 %v1453_v32, %v1441_v51 }
  0xf4   : > { %1720 = vmatpush.bf16.msrb.mxu2 %v2469_v61 }
  0xf5   : > { %1733 = vmatpush.bf16.msrb.mxu3 %v2597_v1  ;;  %v1467_v61 = vadd.f32 %v1466_v52, %v1454_v60  ;;  %v445_v52 = vperm.slane %v3639_v23, 3 }
  0xf6   : > { %1695 = vmatpush.bf16.msrb.mxu0 %v2197_v7 }
  0xf7   : > { %1708 = vmatpush.bf16.msrb.mxu1 %v2325_v8  ;;  %v1480_v0 = vadd.f32 %v1479_v18, %v1467_v61 }
  0xf8   : > { %1721 = vmatpush.bf16.msrb.mxu2 %v2453_v9 }
  0xf9   : > { %1734 = vmatpush.bf16.msrb.mxu3 %v2581_v13  ;;  %v1468_v62 = vpop.f32.mrf.mxu2 }
  0xfa   : > { %1696 = vmatpush.bf16.msrb.mxu0 %v2181_v25  ;;  %v1481_v63 = vpop.f32.mrf.mxu3 }
  0xfb   : > { %1709 = vmatpush.bf16.msrb.mxu1 %v2309_v27 }
  0xfc   : > { %1722 = vmatpush.bf16.msrb.mxu2 %v2437_v28 }
  0xfd   : > { %1735 = vmatpush.bf16.msrb.mxu3 %v2565_v33  ;;  %v444_v33 = vperm.slane %v3639_v23, 2 }
  0xfe   : > { %1697 = vmatpush.bf16.msrb.mxu0 %v2165_v41 }
  0xff   : > { %1710 = vmatpush.bf16.msrb.mxu1 %v2293_v42 }
 0x100   : > { %1723 = vmatpush.bf16.msrb.mxu2 %v2421_v43 }
 0x101   : > { %1736 = vmatpush.bf16.msrb.mxu3 %v2549_v47 }
 0x102   : > { %1698 = vmatpush.bf16.msrb.mxu0 %v2149_v55  ;;  %v1492_v1 = vpop.f32.mrf.mxu0 }
 0x103   : > { %1711 = vmatpush.bf16.msrb.mxu1 %v2277_v56  ;;  %v1493_v2 = vadd.f32 %v1492_v1, %v1480_v0  ;;  %v1505_v3 = vpop.f32.mrf.mxu1 }
 0x104   : > { %1724 = vmatpush.bf16.msrb.mxu2 %v2405_v57 }
 0x105   : > { %1737 = vmatpush.bf16.msrb.mxu3 %v2533_v59  ;;  %1699 = vmatmul.bf16.vlgmr.msrb.gmra.mxu0 %v3334_v19  ;;  %v1506_v4 = vadd.f32 %v1505_v3, %v1493_v2 }
 0x106   : > { %1712 = vmatmul.bf16.vlgmr.msrb.gmra.mxu1 %v3336_v20 }
 0x107   : > { %1725 = vmatmul.bf16.vlgmr.msrb.gmra.mxu2 %v3390_v35  ;;  %1743 = vst [vmem:[%s3663_s11] sm:$0xff] %v1506_v4  ;;  %v443_v35 = vperm.slane %v3639_v23, 1 }
 0x108   : > { %1738 = vmatmul.bf16.vlgmr.msrb.gmra.mxu3 %v3394_v38 }
 0x10a   : > { %v1518_v5 = vpop.f32.mrf.mxu2  ;;  %v1494_v7 = vpop.f32.mrf.mxu0 }
 0x10b   : > { %v1531_v6 = vpop.f32.mrf.mxu3  ;;  %v1507_v19 = vpop.f32.mrf.mxu1  ;;  %v1519_v38 = vadd.f32 %v1518_v5, %v443_v35 }
 0x10d   : > { %v1532_v9 = vadd.f32 %v1531_v6, %v1519_v38 }
 0x112   : > { %v1520_v20 = vpop.f32.mrf.mxu2 }
 0x113   : > { %v1533_v8 = vpop.f32.mrf.mxu3 }
 0x122   : > { %v1544_v10 = vpop.f32.mrf.mxu0 }
 0x123   : > { %v1545_v11 = vadd.f32 %v1544_v10, %v1532_v9  ;;  %v1557_v12 = vpop.f32.mrf.mxu1 }
 0x125   : > { %v1558_v13 = vadd.f32 %v1557_v12, %v1545_v11 }
 0x12a   : > { %v1570_v14 = vpop.f32.mrf.mxu2  ;;  %v1546_v21 = vpop.f32.mrf.mxu0 }
 0x12b   : > { %v1571_v15 = vadd.f32 %v1570_v14, %v1558_v13  ;;  %v1583_v16 = vpop.f32.mrf.mxu3  ;;  %v1559_v24 = vpop.f32.mrf.mxu1 }
 0x12d   : > { %v1584_v17 = vadd.f32 %v1583_v16, %v1571_v15 }
 0x12f   : > { %1744 = vst [vmem:[%s3663_s11 + $0x8] sm:$0xff] %v1584_v17 }
 0x132   : > { %v1572_v25 = vpop.f32.mrf.mxu2 }
 0x133   : > { %v1585_v26 = vpop.f32.mrf.mxu3 }
 0x142   : > { %v1596_v27 = vpop.f32.mrf.mxu0 }
 0x143   : > { %v1609_v28 = vpop.f32.mrf.mxu1  ;;  %v1597_v34 = vadd.f32 %v1596_v27, %v444_v33 }
 0x145   : > { %v1610_v39 = vadd.f32 %v1609_v28, %v1597_v34 }
 0x14a   : > { %v1622_v29 = vpop.f32.mrf.mxu2  ;;  %v1598_v31 = vpop.f32.mrf.mxu0 }
 0x14b   : > { %v1635_v30 = vpop.f32.mrf.mxu3  ;;  %v1611_v32 = vpop.f32.mrf.mxu1  ;;  %v1623_v40 = vadd.f32 %v1622_v29, %v1610_v39 }
 0x14d   : > { %v1636_v41 = vadd.f32 %v1635_v30, %v1623_v40 }
 0x152   : > { %v1624_v36 = vpop.f32.mrf.mxu2 }
 0x153   : > { %v1637_v37 = vpop.f32.mrf.mxu3 }
 0x162   : > { %v1648_v42 = vpop.f32.mrf.mxu0 }
 0x163   : > { %v1649_v43 = vadd.f32 %v1648_v42, %v1636_v41  ;;  %v1661_v44 = vpop.f32.mrf.mxu1 }
 0x165   : > { %v1662_v45 = vadd.f32 %v1661_v44, %v1649_v43 }
 0x167   : > { %1745 = vst [vmem:[%s3663_s11 + $0x10] sm:$0xff] %v1662_v45 }
 0x16a   : > { %v1674_v46 = vpop.f32.mrf.mxu2  ;;  %v1650_v48 = vpop.f32.mrf.mxu0 }
 0x16b   : > { %v1687_v47 = vpop.f32.mrf.mxu3  ;;  %v1663_v49 = vpop.f32.mrf.mxu1  ;;  %v1675_v18 = vadd.f32 %v1674_v46, %v445_v52 }
 0x16d   : > { %v1688_v53 = vadd.f32 %v1687_v47, %v1675_v18 }
 0x172   : > { %v1676_v50 = vpop.f32.mrf.mxu2 }
 0x173   : > { %v1689_v51 = vpop.f32.mrf.mxu3 }
 0x182   : > { %v1700_v22 = vpop.f32.mrf.mxu0 }
 0x183   : > { %v1713_v54 = vpop.f32.mrf.mxu1  ;;  %v1701_v55 = vadd.f32 %v1700_v22, %v1688_v53 }
 0x185   : > { %v1714_v56 = vadd.f32 %v1713_v54, %v1701_v55 }
 0x18a   : > { %v1726_v57 = vpop.f32.mrf.mxu2  ;;  %v1702_v23 = vpop.f32.mrf.mxu0 }
 0x18b   : > { %v1727_v58 = vadd.f32 %v1726_v57, %v1714_v56  ;;  %v1739_v59 = vpop.f32.mrf.mxu3  ;;  %v1715_v60 = vpop.f32.mrf.mxu1 }
 0x18d   : > { %v1740_v61 = vadd.f32 %v1739_v59, %v1727_v58 }
 0x18f   : > { %1746 = vst [vmem:[%s3663_s11 + $0x18] sm:$0xff] %v1740_v61 }
 0x190   : > { %3029 = shalt.err (!%p3026_p5)
}
 0x191   : > { %2855 = dma.vmem_to_hbm [thread:$0]  (%p3181_p11), %s1762_s21, 512, %s1764_s28, %s1748_s29  }
 0x192   : > { %v1728_v62 = vpop.f32.mrf.mxu2 }
 0x193   : > { %v1741_v63 = vpop.f32.mrf.mxu3 }
 0x194 PF: > { %s1775_s30 = sand.u32 1, %s3060_s12   ;;  %p3717_p7 = scmp.ge.s32.totalorder %s3072_s15, 2 }
 0x195   : > { %s1776_s8 = scalar_lea.sflag [#allocation4], %s1775_s30 }
 0x196   : > { %p2869_p9 = pnand %p3717_p7, %p3185_p12 }
 0x198   : > { %p2870_p13 = pneg %p2869_p9 }
 0x19a   : > { %3055 = dma.done.wait (%p2870_p13), %s1776_s8, 512  }
 0x19b   : > { %3057 = vsyncadd (%p2870_p13), %s1776_s8, 4294966784  ;;  %p17_p11 = scmp.ge.s32.totalorder %s3119_s16, 4   ;;  %s3718_s12 = smov %s3064_s13 }
 0x19c   : > { %s3719_s13 = smov %s3068_s14  ;;  %s3720_s14 = smov %s3130_s19 }
 0x19d   : > { %s3721_s15 = smov %s3119_s16  ;;  %19 = sbr.rel (!%p17_p11) target bundleno = 8 (0x8), region = 93 }
 0x1a2   :  { %1782 = vsyncpa [#allocation3], 1 }
 0x1a3   :  { %1784 = vsyncpa [#allocation3 + $0x1], 1 }
 0x1a4   :  { %1785 = vsyncpa [#allocation6], 1 }
 0x1a5   :  { %1787 = vsyncpa [#allocation6 + $0x1], 1 }
 0x1a6   :  { %1788 = vsyncpa [#allocation4], 1 }
 0x1a7   :  { %1790 = vsyncpa [#allocation4 + $0x1], 1 }

</bundles_post_ra>
